<compile_context>
chip_gen: v7x
topology: tpu7x:2x2x1
jax: 0.10.0
libtpu: 0.0.40
codegen_flags: <defaults>
</compile_context>

<pallas_src>
import jax
import jax.numpy as jnp
from jax.experimental import pallas as pl
from jax.experimental.pallas import tpu as pltpu

INPUT_SIZE = 28 * 28   # 784 logical feature width
IN_PAD = 896           # 7 * 128, lane-padded feature width
HIDDEN = 256
LATENT = 15            # logical latent width
LAT_PAD = 128          # lane-padded latent width


def _vae_kernel(
    x_ref, eps_ref,
    # encoder
    w1_ref, b1_ref, w2_ref, b2_ref, w3_ref, b3_ref,
    # fused mu|logvar head (lane-padded)
    wh_ref, bh_ref,
    # decoder
    dw1_ref, db1_ref, dw2_ref, db2_ref, dw3_ref, db3_ref, dw4_ref, db4_ref,
    # outputs
    xhat_ref, mu_ref, logvar_ref,
):
    f32 = jnp.float32
    bf16 = jnp.bfloat16

    def linear(h, w_ref, b_ref):
        # bf16 MXU inputs, f32 accumulate, f32 bias add.
        return jnp.dot(h.astype(bf16), w_ref[...],
                       preferred_element_type=f32) + b_ref[...]

    # ----- encoder: 3x (Linear + ReLU) -----
    h = jnp.maximum(linear(x_ref[...], w1_ref, b1_ref), 0.0)
    h = jnp.maximum(linear(h, w2_ref, b2_ref), 0.0)
    h = jnp.maximum(linear(h, w3_ref, b3_ref), 0.0)

    # ----- fused latent heads: one (HIDDEN, 2*LAT_PAD) matmul -----
    head = linear(h, wh_ref, bh_ref)          # (TB, 2*LAT_PAD)
    mu = head[:, :LAT_PAD]                    # padded lanes are exactly zero
    logvar = head[:, LAT_PAD:]                # padded lanes are exactly zero

    # ----- reparametrize: z = mu + exp(0.5*logvar) * eps -----
    # padded eps lanes are zero, so padded z lanes stay zero.
    z = mu + jnp.exp(0.5 * logvar) * eps_ref[...]

    # ----- decoder: 3x (Linear + ReLU) + Linear + Sigmoid -----
    d = jnp.maximum(linear(z, dw1_ref, db1_ref), 0.0)
    d = jnp.maximum(linear(d, dw2_ref, db2_ref), 0.0)
    d = jnp.maximum(linear(d, dw3_ref, db3_ref), 0.0)
    logits = linear(d, dw4_ref, db4_ref)
    xhat_ref[...] = pl.reciprocal(1.0 + jnp.exp(-logits), approx=True)

    mu_ref[...] = mu
    logvar_ref[...] = logvar


def _pad2(a, rows, cols):
    r, c = a.shape
    return jnp.pad(a, ((0, rows - r), (0, cols - c)))


@jax.jit
def vae_forward(x_nchw, eps, params):
    (w1, b1, w2, b2, w3, b3, wmu, bmu, wlv, blv,
     dw1, db1, dw2, db2, dw3, db3, dw4, db4) = params

    N = x_nchw.shape[0]

    # ---- batch tiling: TB rows per grid step (multiple of 8, capped at 256) ----
    TB = 256
    if N < TB:
        TB = max(8, -(-N // 8) * 8)
    padded_N = -(-N // TB) * TB
    grid = (padded_N // TB,)

    # ---- lane-pad / fuse / cast parameters (padding is zeros so padded lanes
    #      stay exactly zero through the whole network) ----
    bf16 = jnp.bfloat16
    w1p = _pad2(w1, IN_PAD, HIDDEN).astype(bf16)
    wh = jnp.concatenate([_pad2(wmu, HIDDEN, LAT_PAD),
                          _pad2(wlv, HIDDEN, LAT_PAD)], axis=1).astype(bf16)
    bh = jnp.concatenate([_pad2(bmu, 1, LAT_PAD),
                          _pad2(blv, 1, LAT_PAD)], axis=1)
    dw1p = _pad2(dw1, LAT_PAD, HIDDEN).astype(bf16)
    dw4p = _pad2(dw4, HIDDEN, IN_PAD).astype(bf16)
    db4p = _pad2(db4, 1, IN_PAD)

    kernel_params = [
        w1p, b1, w2.astype(bf16), b2, w3.astype(bf16), b3,
        wh, bh,
        dw1p, db1, dw2.astype(bf16), db2, dw3.astype(bf16), db3, dw4p, db4p,
    ]

    # ---- activations: flatten, pad batch + feature lanes, bf16 input ----
    x_flat = x_nchw.reshape(N, -1).astype(jnp.float32)
    x_pad = _pad2(x_flat, padded_N, IN_PAD).astype(bf16)
    eps_pad = _pad2(eps.astype(jnp.float32), padded_N, LAT_PAD)

    def tiled(shape):
        return pl.BlockSpec((TB, shape[1]), lambda i: (i, 0))

    def resident(shape):
        return pl.BlockSpec(shape, lambda i: (0, 0))

    in_specs = ([tiled(x_pad.shape), tiled(eps_pad.shape)]
                + [resident(p.shape) for p in kernel_params])

    out_shapes = (
        jax.ShapeDtypeStruct((padded_N, IN_PAD), jnp.float32),   # x_hat (padded)
        jax.ShapeDtypeStruct((padded_N, LAT_PAD), jnp.float32),  # mu (padded)
        jax.ShapeDtypeStruct((padded_N, LAT_PAD), jnp.float32),  # logvar (padded)
    )
    out_specs = tuple(tiled(s.shape) for s in out_shapes)

    xhat_pad, mu_pad, logvar_pad = pl.pallas_call(
        _vae_kernel,
        grid=grid,
        in_specs=in_specs,
        out_specs=out_specs,
        out_shape=out_shapes,
        compiler_params=pltpu.CompilerParams(
            dimension_semantics=("parallel",),
            vmem_limit_bytes=32 * 1024 * 1024,
        ),
    )(x_pad, eps_pad, *kernel_params)

    x_hat = xhat_pad[:N, :INPUT_SIZE].reshape(N, 1, 28, 28)
    mu = mu_pad[:N, :LATENT]
    logvar = logvar_pad[:N, :LATENT]
    return x_hat, mu, logvar


def init_params(key):
    """Deterministic init mirroring nn.Linear default (U[-1/sqrt(fan_in), 1/sqrt(fan_in)]).

    Weights are stored as (in_features, out_features) so the kernel computes h @ W + b.
    Biases are stored as (1, out_features) for clean 2-D broadcasting on TPU.
    """
    dims = [
        (INPUT_SIZE, HIDDEN),  # encoder L1
        (HIDDEN, HIDDEN),      # encoder L2
        (HIDDEN, HIDDEN),      # encoder L3
        (HIDDEN, LATENT),      # mu head
        (HIDDEN, LATENT),      # logvar head
        (LATENT, HIDDEN),      # decoder L1
        (HIDDEN, HIDDEN),      # decoder L2
        (HIDDEN, HIDDEN),      # decoder L3
        (HIDDEN, INPUT_SIZE),  # decoder L4
    ]
    params = []
    for (fan_in, fan_out) in dims:
        key, kw, kb = jax.random.split(key, 3)
        bound = 1.0 / (fan_in ** 0.5)
        w = jax.random.uniform(kw, (fan_in, fan_out), jnp.float32, -bound, bound)
        b = jax.random.uniform(kb, (1, fan_out), jnp.float32, -bound, bound)
        params.append(w)
        params.append(b)
    return params


if __name__ == "__main__":
    key = jax.random.PRNGKey(0)
    key_x, key_eps, key_p = jax.random.split(key, 3)

    N = 2
    x = jax.random.uniform(key_x, (N, 1, 28, 28), jnp.float32)   # NCHW image batch
    eps = jax.random.normal(key_eps, (N, LATENT), jnp.float32)   # reparam noise
    params = init_params(key_p)

    x_hat, mu, logvar = vae_forward(x, eps, params)
    jax.block_until_ready((x_hat, mu, logvar))

    assert x_hat.shape == (N, 1, 28, 28)
    assert mu.shape == (N, LATENT)
    assert logvar.shape == (N, LATENT)

    # Pure-JAX f32 reference for a sanity check (kernel uses bf16 matmul
    # inputs with f32 accumulation -> loose tolerance).
    def ref_forward(x_nchw, eps, p):
        (w1, b1, w2, b2, w3, b3, wmu, bmu, wlv, blv,
         dw1, db1, dw2, db2, dw3, db3, dw4, db4) = p
        h = x_nchw.reshape(x_nchw.shape[0], -1)
        h = jnp.maximum(h @ w1 + b1, 0.0)
        h = jnp.maximum(h @ w2 + b2, 0.0)
        h = jnp.maximum(h @ w3 + b3, 0.0)
        mu_r = h @ wmu + bmu
        lv_r = h @ wlv + blv
        z = mu_r + jnp.exp(0.5 * lv_r) * eps
        d = jnp.maximum(z @ dw1 + db1, 0.0)
        d = jnp.maximum(d @ dw2 + db2, 0.0)
        d = jnp.maximum(d @ dw3 + db3, 0.0)
        xr = jax.nn.sigmoid(d @ dw4 + db4).reshape(-1, 1, 28, 28)
        return xr, mu_r, lv_r

    xr, mr, lr = ref_forward(x, eps, params)
    assert jnp.allclose(x_hat, xr, atol=3e-2), float(jnp.max(jnp.abs(x_hat - xr)))
    assert jnp.allclose(mu, mr, atol=3e-2), float(jnp.max(jnp.abs(mu - mr)))
    assert jnp.allclose(logvar, lr, atol=3e-2), float(jnp.max(jnp.abs(logvar - lr)))

    print("KERNEL_OK")
</pallas_src>

<mosaic_0001>
module attributes {stable_mosaic.version = 11 : i64} {
  func.func @_vae_kernel(%arg0: i32, %arg1: memref<8x896xbf16, #tpu.memory_space<vmem>>, %arg2: memref<8x128xf32, #tpu.memory_space<vmem>>, %arg3: memref<896x256xbf16, #tpu.memory_space<vmem>>, %arg4: memref<1x256xf32, #tpu.memory_space<vmem>>, %arg5: memref<256x256xbf16, #tpu.memory_space<vmem>>, %arg6: memref<1x256xf32, #tpu.memory_space<vmem>>, %arg7: memref<256x256xbf16, #tpu.memory_space<vmem>>, %arg8: memref<1x256xf32, #tpu.memory_space<vmem>>, %arg9: memref<256x256xbf16, #tpu.memory_space<vmem>>, %arg10: memref<1x256xf32, #tpu.memory_space<vmem>>, %arg11: memref<128x256xbf16, #tpu.memory_space<vmem>>, %arg12: memref<1x256xf32, #tpu.memory_space<vmem>>, %arg13: memref<256x256xbf16, #tpu.memory_space<vmem>>, %arg14: memref<1x256xf32, #tpu.memory_space<vmem>>, %arg15: memref<256x256xbf16, #tpu.memory_space<vmem>>, %arg16: memref<1x256xf32, #tpu.memory_space<vmem>>, %arg17: memref<256x896xbf16, #tpu.memory_space<vmem>>, %arg18: memref<1x896xf32, #tpu.memory_space<vmem>>, %arg19: memref<8x896xf32, #tpu.memory_space<vmem>>, %arg20: memref<8x128xf32, #tpu.memory_space<vmem>>, %arg21: memref<8x128xf32, #tpu.memory_space<vmem>>) attributes {dimension_semantics = [#tpu.dimension_semantics<parallel>], iteration_bounds = array<i64: 1>, scalar_prefetch = 0 : i64, scratch_operands = 0 : i64, tpu.core_type = #tpu.core_type<tc>, window_params = [{transform_indices = @transform_0, window_bounds = array<i64: 8, 896>}, {transform_indices = @transform_1, window_bounds = array<i64: 8, 128>}, {pipeline_mode = #tpu.pipeline_mode<synchronous>, transform_indices = @transform_2, window_bounds = array<i64: 896, 256>}, {pipeline_mode = #tpu.pipeline_mode<synchronous>, transform_indices = @transform_3, window_bounds = array<i64: 1, 256>}, {pipeline_mode = #tpu.pipeline_mode<synchronous>, transform_indices = @transform_4, window_bounds = array<i64: 256, 256>}, {pipeline_mode = #tpu.pipeline_mode<synchronous>, transform_indices = @transform_5, window_bounds = array<i64: 1, 256>}, {pipeline_mode = #tpu.pipeline_mode<synchronous>, transform_indices = @transform_6, window_bounds = array<i64: 256, 256>}, {pipeline_mode = #tpu.pipeline_mode<synchronous>, transform_indices = @transform_7, window_bounds = array<i64: 1, 256>}, {pipeline_mode = #tpu.pipeline_mode<synchronous>, transform_indices = @transform_8, window_bounds = array<i64: 256, 256>}, {pipeline_mode = #tpu.pipeline_mode<synchronous>, transform_indices = @transform_9, window_bounds = array<i64: 1, 256>}, {pipeline_mode = #tpu.pipeline_mode<synchronous>, transform_indices = @transform_10, window_bounds = array<i64: 128, 256>}, {pipeline_mode = #tpu.pipeline_mode<synchronous>, transform_indices = @transform_11, window_bounds = array<i64: 1, 256>}, {pipeline_mode = #tpu.pipeline_mode<synchronous>, transform_indices = @transform_12, window_bounds = array<i64: 256, 256>}, {pipeline_mode = #tpu.pipeline_mode<synchronous>, transform_indices = @transform_13, window_bounds = array<i64: 1, 256>}, {pipeline_mode = #tpu.pipeline_mode<synchronous>, transform_indices = @transform_14, window_bounds = array<i64: 256, 256>}, {pipeline_mode = #tpu.pipeline_mode<synchronous>, transform_indices = @transform_15, window_bounds = array<i64: 1, 256>}, {pipeline_mode = #tpu.pipeline_mode<synchronous>, transform_indices = @transform_16, window_bounds = array<i64: 256, 896>}, {pipeline_mode = #tpu.pipeline_mode<synchronous>, transform_indices = @transform_17, window_bounds = array<i64: 1, 896>}, {transform_indices = @transform_18, window_bounds = array<i64: 8, 896>}, {transform_indices = @transform_19, window_bounds = array<i64: 8, 128>}, {transform_indices = @transform_20, window_bounds = array<i64: 8, 128>}]} {
    %c0 = arith.constant 0 : index
    %c0_0 = arith.constant 0 : index
    %0 = vector.load %arg1[%c0, %c0_0] : memref<8x896xbf16, #tpu.memory_space<vmem>>, vector<8x896xbf16>
    %c0_1 = arith.constant 0 : index
    %c0_2 = arith.constant 0 : index
    %1 = vector.load %arg3[%c0_1, %c0_2] : memref<896x256xbf16, #tpu.memory_space<vmem>>, vector<896x256xbf16>
    %cst = arith.constant dense<0.000000e+00> : vector<8x256xf32>
    %2 = tpu.matmul %0, %1, %cst {dimension_numbers = #tpu.dot_dimension_numbers<[1], [0], [0], [1], [0, 0, 1, 1], [], []>} : vector<8x896xbf16>, vector<896x256xbf16>, vector<8x256xf32> -> vector<8x256xf32>
    %c0_3 = arith.constant 0 : index
    %c0_4 = arith.constant 0 : index
    %3 = vector.load %arg4[%c0_3, %c0_4] : memref<1x256xf32, #tpu.memory_space<vmem>>, vector<1x256xf32>
    %4 = vector.broadcast %3 : vector<1x256xf32> to vector<8x256xf32>
    %5 = arith.addf %2, %4 : vector<8x256xf32>
    %cst_5 = arith.constant 0.000000e+00 : f32
    %6 = vector.broadcast %cst_5 : f32 to vector<8x256xf32>
    %7 = arith.maximumf %5, %6 : vector<8x256xf32>
    %8 = arith.truncf %7 : vector<8x256xf32> to vector<8x256xbf16>
    %c0_6 = arith.constant 0 : index
    %c0_7 = arith.constant 0 : index
    %9 = vector.load %arg5[%c0_6, %c0_7] : memref<256x256xbf16, #tpu.memory_space<vmem>>, vector<256x256xbf16>
    %cst_8 = arith.constant dense<0.000000e+00> : vector<8x256xf32>
    %10 = tpu.matmul %8, %9, %cst_8 {dimension_numbers = #tpu.dot_dimension_numbers<[1], [0], [0], [1], [0, 0, 1, 1], [], []>} : vector<8x256xbf16>, vector<256x256xbf16>, vector<8x256xf32> -> vector<8x256xf32>
    %c0_9 = arith.constant 0 : index
    %c0_10 = arith.constant 0 : index
    %11 = vector.load %arg6[%c0_9, %c0_10] : memref<1x256xf32, #tpu.memory_space<vmem>>, vector<1x256xf32>
    %12 = vector.broadcast %11 : vector<1x256xf32> to vector<8x256xf32>
    %13 = arith.addf %10, %12 : vector<8x256xf32>
    %cst_11 = arith.constant 0.000000e+00 : f32
    %14 = vector.broadcast %cst_11 : f32 to vector<8x256xf32>
    %15 = arith.maximumf %13, %14 : vector<8x256xf32>
    %16 = arith.truncf %15 : vector<8x256xf32> to vector<8x256xbf16>
    %c0_12 = arith.constant 0 : index
    %c0_13 = arith.constant 0 : index
    %17 = vector.load %arg7[%c0_12, %c0_13] : memref<256x256xbf16, #tpu.memory_space<vmem>>, vector<256x256xbf16>
    %cst_14 = arith.constant dense<0.000000e+00> : vector<8x256xf32>
    %18 = tpu.matmul %16, %17, %cst_14 {dimension_numbers = #tpu.dot_dimension_numbers<[1], [0], [0], [1], [0, 0, 1, 1], [], []>} : vector<8x256xbf16>, vector<256x256xbf16>, vector<8x256xf32> -> vector<8x256xf32>
    %c0_15 = arith.constant 0 : index
    %c0_16 = arith.constant 0 : index
    %19 = vector.load %arg8[%c0_15, %c0_16] : memref<1x256xf32, #tpu.memory_space<vmem>>, vector<1x256xf32>
    %20 = vector.broadcast %19 : vector<1x256xf32> to vector<8x256xf32>
    %21 = arith.addf %18, %20 : vector<8x256xf32>
    %cst_17 = arith.constant 0.000000e+00 : f32
    %22 = vector.broadcast %cst_17 : f32 to vector<8x256xf32>
    %23 = arith.maximumf %21, %22 : vector<8x256xf32>
    %24 = arith.truncf %23 : vector<8x256xf32> to vector<8x256xbf16>
    %c0_18 = arith.constant 0 : index
    %c0_19 = arith.constant 0 : index
    %25 = vector.load %arg9[%c0_18, %c0_19] : memref<256x256xbf16, #tpu.memory_space<vmem>>, vector<256x256xbf16>
    %cst_20 = arith.constant dense<0.000000e+00> : vector<8x256xf32>
    %26 = tpu.matmul %24, %25, %cst_20 {dimension_numbers = #tpu.dot_dimension_numbers<[1], [0], [0], [1], [0, 0, 1, 1], [], []>} : vector<8x256xbf16>, vector<256x256xbf16>, vector<8x256xf32> -> vector<8x256xf32>
    %c0_21 = arith.constant 0 : index
    %c0_22 = arith.constant 0 : index
    %27 = vector.load %arg10[%c0_21, %c0_22] : memref<1x256xf32, #tpu.memory_space<vmem>>, vector<1x256xf32>
    %28 = vector.broadcast %27 : vector<1x256xf32> to vector<8x256xf32>
    %29 = arith.addf %26, %28 : vector<8x256xf32>
    %30 = vector.extract_strided_slice %29 {offsets = [0, 0], sizes = [8, 128], strides = [1, 1]} : vector<8x256xf32> to vector<8x128xf32>
    %31 = vector.extract_strided_slice %29 {offsets = [0, 128], sizes = [8, 128], strides = [1, 1]} : vector<8x256xf32> to vector<8x128xf32>
    %cst_23 = arith.constant 5.000000e-01 : f32
    %32 = vector.broadcast %cst_23 : f32 to vector<8x128xf32>
    %33 = arith.mulf %32, %31 : vector<8x128xf32>
    %34 = math.exp %33 : vector<8x128xf32>
    %c0_24 = arith.constant 0 : index
    %c0_25 = arith.constant 0 : index
    %35 = vector.load %arg2[%c0_24, %c0_25] : memref<8x128xf32, #tpu.memory_space<vmem>>, vector<8x128xf32>
    %36 = arith.mulf %34, %35 : vector<8x128xf32>
    %37 = arith.addf %30, %36 : vector<8x128xf32>
    %38 = arith.truncf %37 : vector<8x128xf32> to vector<8x128xbf16>
    %c0_26 = arith.constant 0 : index
    %c0_27 = arith.constant 0 : index
    %39 = vector.load %arg11[%c0_26, %c0_27] : memref<128x256xbf16, #tpu.memory_space<vmem>>, vector<128x256xbf16>
    %cst_28 = arith.constant dense<0.000000e+00> : vector<8x256xf32>
    %40 = tpu.matmul %38, %39, %cst_28 {dimension_numbers = #tpu.dot_dimension_numbers<[1], [0], [0], [1], [0, 0, 1, 1], [], []>} : vector<8x128xbf16>, vector<128x256xbf16>, vector<8x256xf32> -> vector<8x256xf32>
    %c0_29 = arith.constant 0 : index
    %c0_30 = arith.constant 0 : index
    %41 = vector.load %arg12[%c0_29, %c0_30] : memref<1x256xf32, #tpu.memory_space<vmem>>, vector<1x256xf32>
    %42 = vector.broadcast %41 : vector<1x256xf32> to vector<8x256xf32>
    %43 = arith.addf %40, %42 : vector<8x256xf32>
    %cst_31 = arith.constant 0.000000e+00 : f32
    %44 = vector.broadcast %cst_31 : f32 to vector<8x256xf32>
    %45 = arith.maximumf %43, %44 : vector<8x256xf32>
    %46 = arith.truncf %45 : vector<8x256xf32> to vector<8x256xbf16>
    %c0_32 = arith.constant 0 : index
    %c0_33 = arith.constant 0 : index
    %47 = vector.load %arg13[%c0_32, %c0_33] : memref<256x256xbf16, #tpu.memory_space<vmem>>, vector<256x256xbf16>
    %cst_34 = arith.constant dense<0.000000e+00> : vector<8x256xf32>
    %48 = tpu.matmul %46, %47, %cst_34 {dimension_numbers = #tpu.dot_dimension_numbers<[1], [0], [0], [1], [0, 0, 1, 1], [], []>} : vector<8x256xbf16>, vector<256x256xbf16>, vector<8x256xf32> -> vector<8x256xf32>
    %c0_35 = arith.constant 0 : index
    %c0_36 = arith.constant 0 : index
    %49 = vector.load %arg14[%c0_35, %c0_36] : memref<1x256xf32, #tpu.memory_space<vmem>>, vector<1x256xf32>
    %50 = vector.broadcast %49 : vector<1x256xf32> to vector<8x256xf32>
    %51 = arith.addf %48, %50 : vector<8x256xf32>
    %cst_37 = arith.constant 0.000000e+00 : f32
    %52 = vector.broadcast %cst_37 : f32 to vector<8x256xf32>
    %53 = arith.maximumf %51, %52 : vector<8x256xf32>
    %54 = arith.truncf %53 : vector<8x256xf32> to vector<8x256xbf16>
    %c0_38 = arith.constant 0 : index
    %c0_39 = arith.constant 0 : index
    %55 = vector.load %arg15[%c0_38, %c0_39] : memref<256x256xbf16, #tpu.memory_space<vmem>>, vector<256x256xbf16>
    %cst_40 = arith.constant dense<0.000000e+00> : vector<8x256xf32>
    %56 = tpu.matmul %54, %55, %cst_40 {dimension_numbers = #tpu.dot_dimension_numbers<[1], [0], [0], [1], [0, 0, 1, 1], [], []>} : vector<8x256xbf16>, vector<256x256xbf16>, vector<8x256xf32> -> vector<8x256xf32>
    %c0_41 = arith.constant 0 : index
    %c0_42 = arith.constant 0 : index
    %57 = vector.load %arg16[%c0_41, %c0_42] : memref<1x256xf32, #tpu.memory_space<vmem>>, vector<1x256xf32>
    %58 = vector.broadcast %57 : vector<1x256xf32> to vector<8x256xf32>
    %59 = arith.addf %56, %58 : vector<8x256xf32>
    %cst_43 = arith.constant 0.000000e+00 : f32
    %60 = vector.broadcast %cst_43 : f32 to vector<8x256xf32>
    %61 = arith.maximumf %59, %60 : vector<8x256xf32>
    %62 = arith.truncf %61 : vector<8x256xf32> to vector<8x256xbf16>
    %c0_44 = arith.constant 0 : index
    %c0_45 = arith.constant 0 : index
    %63 = vector.load %arg17[%c0_44, %c0_45] : memref<256x896xbf16, #tpu.memory_space<vmem>>, vector<256x896xbf16>
    %cst_46 = arith.constant dense<0.000000e+00> : vector<8x896xf32>
    %64 = tpu.matmul %62, %63, %cst_46 {dimension_numbers = #tpu.dot_dimension_numbers<[1], [0], [0], [1], [0, 0, 1, 1], [], []>} : vector<8x256xbf16>, vector<256x896xbf16>, vector<8x896xf32> -> vector<8x896xf32>
    %c0_47 = arith.constant 0 : index
    %c0_48 = arith.constant 0 : index
    %65 = vector.load %arg18[%c0_47, %c0_48] : memref<1x896xf32, #tpu.memory_space<vmem>>, vector<1x896xf32>
    %66 = vector.broadcast %65 : vector<1x896xf32> to vector<8x896xf32>
    %67 = arith.addf %64, %66 : vector<8x896xf32>
    %cst_49 = arith.constant 0.000000e+00 : f32
    %68 = vector.broadcast %cst_49 : f32 to vector<8x896xf32>
    %69 = arith.subf %68, %67 : vector<8x896xf32>
    %70 = math.exp %69 : vector<8x896xf32>
    %cst_50 = arith.constant 1.000000e+00 : f32
    %71 = vector.broadcast %cst_50 : f32 to vector<8x896xf32>
    %72 = arith.addf %71, %70 : vector<8x896xf32>
    %73 = tpu.reciprocal %72 {approx = true} : vector<8x896xf32> -> vector<8x896xf32>
    %c0_51 = arith.constant 0 : index
    %c0_52 = arith.constant 0 : index
    %74 = vector.load %arg19[%c0_51, %c0_52] : memref<8x896xf32, #tpu.memory_space<vmem>>, vector<8x896xf32>
    tpu.vector_store %arg19[%c0_51, %c0_52], %73 {strides = array<i32>} : memref<8x896xf32, #tpu.memory_space<vmem>>, vector<8x896xf32>,
    %c0_53 = arith.constant 0 : index
    %c0_54 = arith.constant 0 : index
    %75 = vector.load %arg20[%c0_53, %c0_54] : memref<8x128xf32, #tpu.memory_space<vmem>>, vector<8x128xf32>
    tpu.vector_store %arg20[%c0_53, %c0_54], %30 {strides = array<i32>} : memref<8x128xf32, #tpu.memory_space<vmem>>, vector<8x128xf32>,
    %c0_55 = arith.constant 0 : index
    %c0_56 = arith.constant 0 : index
    %76 = vector.load %arg21[%c0_55, %c0_56] : memref<8x128xf32, #tpu.memory_space<vmem>>, vector<8x128xf32>
    tpu.vector_store %arg21[%c0_55, %c0_56], %31 {strides = array<i32>} : memref<8x128xf32, #tpu.memory_space<vmem>>, vector<8x128xf32>,
    return
  }
  func.func @transform_0(%arg0: i32) -> (i32, i32) {
    %c0_i32 = arith.constant 0 : i32
    %c0_i32_0 = arith.constant 0 : i32
    return %arg0, %c0_i32 : i32, i32
  }
  func.func @transform_1(%arg0: i32) -> (i32, i32) {
    %c0_i32 = arith.constant 0 : i32
    %c0_i32_0 = arith.constant 0 : i32
    return %arg0, %c0_i32 : i32, i32
  }
  func.func @transform_2(%arg0: i32) -> (i32, i32) {
    %c0_i32 = arith.constant 0 : i32
    %c0_i32_0 = arith.constant 0 : i32
    %c0_i32_1 = arith.constant 0 : i32
    return %c0_i32, %c0_i32_0 : i32, i32
  }
  func.func @transform_3(%arg0: i32) -> (i32, i32) {
    %c0_i32 = arith.constant 0 : i32
    %c0_i32_0 = arith.constant 0 : i32
    %c0_i32_1 = arith.constant 0 : i32
    return %c0_i32, %c0_i32_0 : i32, i32
  }
  func.func @transform_4(%arg0: i32) -> (i32, i32) {
    %c0_i32 = arith.constant 0 : i32
    %c0_i32_0 = arith.constant 0 : i32
    %c0_i32_1 = arith.constant 0 : i32
    return %c0_i32, %c0_i32_0 : i32, i32
  }
  func.func @transform_5(%arg0: i32) -> (i32, i32) {
    %c0_i32 = arith.constant 0 : i32
    %c0_i32_0 = arith.constant 0 : i32
    %c0_i32_1 = arith.constant 0 : i32
    return %c0_i32, %c0_i32_0 : i32, i32
  }
  func.func @transform_6(%arg0: i32) -> (i32, i32) {
    %c0_i32 = arith.constant 0 : i32
    %c0_i32_0 = arith.constant 0 : i32
    %c0_i32_1 = arith.constant 0 : i32
    return %c0_i32, %c0_i32_0 : i32, i32
  }
  func.func @transform_7(%arg0: i32) -> (i32, i32) {
    %c0_i32 = arith.constant 0 : i32
    %c0_i32_0 = arith.constant 0 : i32
    %c0_i32_1 = arith.constant 0 : i32
    return %c0_i32, %c0_i32_0 : i32, i32
  }
  func.func @transform_8(%arg0: i32) -> (i32, i32) {
    %c0_i32 = arith.constant 0 : i32
    %c0_i32_0 = arith.constant 0 : i32
    %c0_i32_1 = arith.constant 0 : i32
    return %c0_i32, %c0_i32_0 : i32, i32
  }
  func.func @transform_9(%arg0: i32) -> (i32, i32) {
    %c0_i32 = arith.constant 0 : i32
    %c0_i32_0 = arith.constant 0 : i32
    %c0_i32_1 = arith.constant 0 : i32
    return %c0_i32, %c0_i32_0 : i32, i32
  }
  func.func @transform_10(%arg0: i32) -> (i32, i32) {
    %c0_i32 = arith.constant 0 : i32
    %c0_i32_0 = arith.constant 0 : i32
    %c0_i32_1 = arith.constant 0 : i32
    return %c0_i32, %c0_i32_0 : i32, i32
  }
  func.func @transform_11(%arg0: i32) -> (i32, i32) {
    %c0_i32 = arith.constant 0 : i32
    %c0_i32_0 = arith.constant 0 : i32
    %c0_i32_1 = arith.constant 0 : i32
    return %c0_i32, %c0_i32_0 : i32, i32
  }
  func.func @transform_12(%arg0: i32) -> (i32, i32) {
    %c0_i32 = arith.constant 0 : i32
    %c0_i32_0 = arith.constant 0 : i32
    %c0_i32_1 = arith.constant 0 : i32
    return %c0_i32, %c0_i32_0 : i32, i32
  }
  func.func @transform_13(%arg0: i32) -> (i32, i32) {
    %c0_i32 = arith.constant 0 : i32
    %c0_i32_0 = arith.constant 0 : i32
    %c0_i32_1 = arith.constant 0 : i32
    return %c0_i32, %c0_i32_0 : i32, i32
  }
  func.func @transform_14(%arg0: i32) -> (i32, i32) {
    %c0_i32 = arith.constant 0 : i32
    %c0_i32_0 = arith.constant 0 : i32
    %c0_i32_1 = arith.constant 0 : i32
    return %c0_i32, %c0_i32_0 : i32, i32
  }
  func.func @transform_15(%arg0: i32) -> (i32, i32) {
    %c0_i32 = arith.constant 0 : i32
    %c0_i32_0 = arith.constant 0 : i32
    %c0_i32_1 = arith.constant 0 : i32
    return %c0_i32, %c0_i32_0 : i32, i32
  }
  func.func @transform_16(%arg0: i32) -> (i32, i32) {
    %c0_i32 = arith.constant 0 : i32
    %c0_i32_0 = arith.constant 0 : i32
    %c0_i32_1 = arith.constant 0 : i32
    return %c0_i32, %c0_i32_0 : i32, i32
  }
  func.func @transform_17(%arg0: i32) -> (i32, i32) {
    %c0_i32 = arith.constant 0 : i32
    %c0_i32_0 = arith.constant 0 : i32
    %c0_i32_1 = arith.constant 0 : i32
    return %c0_i32, %c0_i32_0 : i32, i32
  }
  func.func @transform_18(%arg0: i32) -> (i32, i32) {
    %c0_i32 = arith.constant 0 : i32
    %c0_i32_0 = arith.constant 0 : i32
    return %arg0, %c0_i32 : i32, i32
  }
  func.func @transform_19(%arg0: i32) -> (i32, i32) {
    %c0_i32 = arith.constant 0 : i32
    %c0_i32_0 = arith.constant 0 : i32
    return %arg0, %c0_i32 : i32, i32
  }
  func.func @transform_20(%arg0: i32) -> (i32, i32) {
    %c0_i32 = arith.constant 0 : i32
    %c0_i32_0 = arith.constant 0 : i32
    return %arg0, %c0_i32 : i32, i32
  }
}

</mosaic_0001>

<bundles_post_ra>
// kernel: vae_forward.1
= control target key start
LH: loop header
LB: loop body
LE: loop exit
PB: predicated region body
PF: predicated region fallthrough
CT: control target
= control target key end

     0   :  { %s5808_s2 = inlined_call_operand.vmem [shape: bf16[896,256], index: 2, kind: input, shape index: {}]   ;;  %s5809_s0 = inlined_call_operand.vmem [shape: bf16[8,896], index: 0, kind: input, shape index: {}]   ;;  %s5810_s4 = inlined_call_operand.vmem [shape: bf16[256,256], index: 4, kind: input, shape index: {}]   ;;  %s5811_s6 = inlined_call_operand.vmem [shape: bf16[256,256], index: 6, kind: input, shape index: {}]   ;;  %s5812_s3 = inlined_call_operand.vmem [shape: f32[1,256], index: 3, kind: input, shape index: {}]   ;;  %s5813_s8 = inlined_call_operand.vmem [shape: bf16[256,256], index: 8, kind: input, shape index: {}]   ;;  %s5814_s5 = inlined_call_operand.vmem [shape: f32[1,256], index: 5, kind: input, shape index: {}]   ;;  %s5815_s10 = inlined_call_operand.vmem [shape: bf16[128,256], index: 10, kind: input, shape index: {}]   ;;  %s5816_s7 = inlined_call_operand.vmem [shape: f32[1,256], index: 7, kind: input, shape index: {}]   ;;  %s5817_s12 = inlined_call_operand.vmem [shape: bf16[256,256], index: 12, kind: input, shape index: {}]   ;;  %s5818_s9 = inlined_call_operand.vmem [shape: f32[1,256], index: 9, kind: input, shape index: {}]   ;;  %s5819_s19 = inlined_call_operand.vmem [shape: f32[8,128], index: 19, kind: output, shape index: {1}]   ;;  %s5820_s20 = inlined_call_operand.vmem [shape: f32[8,128], index: 20, kind: output, shape index: {2}]   ;;  %s5821_s1 = inlined_call_operand.vmem [shape: f32[8,128], index: 1, kind: input, shape index: {}]   ;;  %s5822_s14 = inlined_call_operand.vmem [shape: bf16[256,256], index: 14, kind: input, shape index: {}]   ;;  %s5823_s11 = inlined_call_operand.vmem [shape: f32[1,256], index: 11, kind: input, shape index: {}]   ;;  %s5824_s16 = inlined_call_operand.vmem [shape: bf16[256,896], index: 16, kind: input, shape index: {}]   ;;  %s5825_s13 = inlined_call_operand.vmem [shape: f32[1,256], index: 13, kind: input, shape index: {}]   ;;  %s5826_s15 = inlined_call_operand.vmem [shape: f32[1,256], index: 15, kind: input, shape index: {}]   ;;  %s5827_s17 = inlined_call_operand.vmem [shape: f32[1,896], index: 17, kind: input, shape index: {}]   ;;  %s5828_s18 = inlined_call_operand.vmem [shape: f32[8,896], index: 18, kind: output, shape index: {0}]  }
   0x1   :  { %5833 = sst [smem:[#allocation2_spill]] %s5808_s2 }
   0x2   :  { %5834 = sst [smem:[#allocation3_spill]] %s5809_s0  ;;  %s5838_s23 = sld [smem:[#allocation2_spill]] }
   0x3   :  { %5835 = sst [smem:[#allocation4_spill]] %s5810_s4  ;;  %s5839_s0 = sld [smem:[#allocation3_spill]] }
   0x4   :  { %5836 = sst [smem:[#allocation5_spill]] %s5811_s6  ;;  %s5840_s27 = sld [smem:[#allocation4_spill]] }
   0x5   :  { %5837 = sst [smem:[#allocation6_spill]] %s5812_s3  ;;  %s5841_s2 = sld [smem:[#allocation5_spill]] }
   0x6   :  { %s5842_s24 = sld [smem:[#allocation6_spill]] }
   0x8   :  { %v3749_v0 = vld [vmem:[%s5838_s23 + $0x4] ss:$8 sps:$4 sm:$0xff]   ;;  %v3751_v1 = vld [vmem:[%s5838_s23] ss:$8 sps:$4 sm:$0xff]   ;;  %v3752_v2 = vld [vmem:[%s5838_s23 + $0x14] ss:$8 sps:$4 sm:$0xff]  }
   0x9   :  { %776 = vmatprep.subr.bf16.mxu0 %v3749_v0  ;;  %v3754_v3 = vld [vmem:[%s5838_s23 + $0x10] ss:$8 sps:$4 sm:$0xff]   ;;  %v3755_v4 = vld [vmem:[%s5838_s23 + $0x24] ss:$8 sps:$4 sm:$0xff]   ;;  %v3757_v5 = vld [vmem:[%s5838_s23 + $0x20] ss:$8 sps:$4 sm:$0xff]  }
   0xa   :  { %777 = vmatpush1.bf16.msra.mxu0 %v3751_v1  ;;  %v3758_v6 = vld [vmem:[%s5838_s23 + $0x34] ss:$8 sps:$4 sm:$0xff]   ;;  %v3760_v7 = vld [vmem:[%s5838_s23 + $0x30] ss:$8 sps:$4 sm:$0xff]   ;;  %v3761_v8 = vld [vmem:[%s5838_s23 + $0x44] ss:$8 sps:$4 sm:$0xff]  }
   0xb   :  { %778 = vmatprep.subr.bf16.mxu0 %v3752_v2  ;;  %v3763_v9 = vld [vmem:[%s5838_s23 + $0x40] ss:$8 sps:$4 sm:$0xff]   ;;  %v3764_v10 = vld [vmem:[%s5838_s23 + $0x54] ss:$8 sps:$4 sm:$0xff]   ;;  %v3766_v11 = vld [vmem:[%s5838_s23 + $0x50] ss:$8 sps:$4 sm:$0xff]  }
   0xc   :  { %v3767_v12 = vld [vmem:[%s5838_s23 + $0x64] ss:$8 sps:$4 sm:$0xff]   ;;  %v3769_v15 = vld [vmem:[%s5838_s23 + $0x60] ss:$8 sps:$4 sm:$0xff]   ;;  %v3770_v16 = vld [vmem:[%s5838_s23 + $0x74] ss:$8 sps:$4 sm:$0xff]  }
   0xd   :  { %v63_v13 = vld [vmem:[%s5839_s0] sm:$0xff]  ;;  %v3772_v17 = vld [vmem:[%s5838_s23 + $0x70] ss:$8 sps:$4 sm:$0xff]   ;;  %v3776_v20 = vld [vmem:[%s5838_s23 + $0x94] ss:$8 sps:$4 sm:$0xff]  }
   0xe   :  { %779 = vmatpush1.bf16.msra.mxu0 %v3754_v3  ;;  %v3306_v14 = vcombine.high %v63_v13, %v63_v13  ;;  %v3773_v18 = vld [vmem:[%s5838_s23 + $0x84] ss:$8 sps:$4 sm:$0xff]   ;;  %v3775_v19 = vld [vmem:[%s5838_s23 + $0x80] ss:$8 sps:$4 sm:$0xff]   ;;  %v3778_v21 = vld [vmem:[%s5838_s23 + $0x90] ss:$8 sps:$4 sm:$0xff]   ;;  %v3305_v36 = vcombine.low %v63_v13, %v63_v13 }
   0xf   :  { %780 = vmatprep.subr.bf16.mxu0 %v3755_v4  ;;  %v3779_v22 = vld [vmem:[%s5838_s23 + $0xa4] ss:$8 sps:$4 sm:$0xff]   ;;  %v3781_v23 = vld [vmem:[%s5838_s23 + $0xa0] ss:$8 sps:$4 sm:$0xff]   ;;  %v3782_v24 = vld [vmem:[%s5838_s23 + $0xb4] ss:$8 sps:$4 sm:$0xff]  }
  0x10   :  { %808 = vmatprep.mubr.bf16.mxu0 %v3306_v14  ;;  %v3784_v25 = vld [vmem:[%s5838_s23 + $0xb0] ss:$8 sps:$4 sm:$0xff]   ;;  %v3785_v26 = vld [vmem:[%s5838_s23 + $0xc4] ss:$8 sps:$4 sm:$0xff]   ;;  %v3787_v27 = vld [vmem:[%s5838_s23 + $0xc0] ss:$8 sps:$4 sm:$0xff]  }
  0x11   :  { %v3788_v28 = vld [vmem:[%s5838_s23 + $0xd4] ss:$8 sps:$4 sm:$0xff]   ;;  %v3790_v29 = vld [vmem:[%s5838_s23 + $0xd0] ss:$8 sps:$4 sm:$0xff]   ;;  %v3791_v30 = vld [vmem:[%s5838_s23 + $0xe4] ss:$8 sps:$4 sm:$0xff]  }
  0x12   :  { %781 = vmatpush1.bf16.msra.mxu0 %v3757_v5  ;;  %v3793_v31 = vld [vmem:[%s5838_s23 + $0xe0] ss:$8 sps:$4 sm:$0xff]   ;;  %v3794_v32 = vld [vmem:[%s5838_s23 + $0xf4] ss:$8 sps:$4 sm:$0xff]   ;;  %v3796_v33 = vld [vmem:[%s5838_s23 + $0xf0] ss:$8 sps:$4 sm:$0xff]  }
  0x13   :  { %782 = vmatprep.subr.bf16.mxu0 %v3758_v6  ;;  %v3801_v34 = vld [vmem:[%s5838_s23 + $0x104] ss:$8 sps:$4 sm:$0xff]   ;;  %v3799_v37 = vld [vmem:[%s5838_s23 + $0x100] ss:$8 sps:$4 sm:$0xff]   ;;  %v3804_v39 = vld [vmem:[%s5838_s23 + $0x114] ss:$8 sps:$4 sm:$0xff]  }
  0x14   :  { %v4589_v35 = vld [vmem:[%s5839_s0 + $0x8] sm:$0xff]  ;;  %v3802_v40 = vld [vmem:[%s5838_s23 + $0x110] ss:$8 sps:$4 sm:$0xff]   ;;  %v3810_v43 = vld [vmem:[%s5838_s23 + $0x134] ss:$8 sps:$4 sm:$0xff]  }
  0x15   :  { %v3308_v38 = vcombine.high %v4589_v35, %v4589_v35  ;;  %v3807_v41 = vld [vmem:[%s5838_s23 + $0x124] ss:$8 sps:$4 sm:$0xff]   ;;  %v3805_v42 = vld [vmem:[%s5838_s23 + $0x120] ss:$8 sps:$4 sm:$0xff]   ;;  %v3808_v44 = vld [vmem:[%s5838_s23 + $0x130] ss:$8 sps:$4 sm:$0xff]  }
  0x16   :  { %783 = vmatpush1.bf16.msra.mxu0 %v3760_v7  ;;  %v3813_v45 = vld [vmem:[%s5838_s23 + $0x144] ss:$8 sps:$4 sm:$0xff]   ;;  %v3811_v46 = vld [vmem:[%s5838_s23 + $0x140] ss:$8 sps:$4 sm:$0xff]   ;;  %v3816_v47 = vld [vmem:[%s5838_s23 + $0x154] ss:$8 sps:$4 sm:$0xff]  }
  0x17   :  { %784 = vmatprep.subr.bf16.mxu0 %v3761_v8  ;;  %v3814_v48 = vld [vmem:[%s5838_s23 + $0x150] ss:$8 sps:$4 sm:$0xff]   ;;  %v3819_v49 = vld [vmem:[%s5838_s23 + $0x164] ss:$8 sps:$4 sm:$0xff]   ;;  %v3817_v50 = vld [vmem:[%s5838_s23 + $0x160] ss:$8 sps:$4 sm:$0xff]  }
  0x18   :  { %v3822_v51 = vld [vmem:[%s5838_s23 + $0x174] ss:$8 sps:$4 sm:$0xff]   ;;  %v3820_v52 = vld [vmem:[%s5838_s23 + $0x170] ss:$8 sps:$4 sm:$0xff]   ;;  %v3825_v53 = vld [vmem:[%s5838_s23 + $0x184] ss:$8 sps:$4 sm:$0xff]  }
  0x19   :  { %v3823_v54 = vld [vmem:[%s5838_s23 + $0x180] ss:$8 sps:$4 sm:$0xff]   ;;  %v3828_v55 = vld [vmem:[%s5838_s23 + $0x194] ss:$8 sps:$4 sm:$0xff]   ;;  %v3826_v56 = vld [vmem:[%s5838_s23 + $0x190] ss:$8 sps:$4 sm:$0xff]  }
  0x1a   :  { %785 = vmatpush1.bf16.msra.mxu0 %v3763_v9  ;;  %v3831_v57 = vld [vmem:[%s5838_s23 + $0x1a4] ss:$8 sps:$4 sm:$0xff]   ;;  %v3926_v59 = vld [vmem:[%s5840_s27] ss:$8 sps:$4 sm:$0xff]   ;;  %v3927_v60 = vld [vmem:[%s5840_s27 + $0x14] ss:$8 sps:$4 sm:$0xff]  }
  0x1b   :  { %786 = vmatprep.subr.bf16.mxu0 %v3764_v10  ;;  %v3924_v58 = vld [vmem:[%s5840_s27 + $0x4] ss:$8 sps:$4 sm:$0xff]   ;;  %v3829_v61 = vld [vmem:[%s5838_s23 + $0x1a0] ss:$8 sps:$4 sm:$0xff]   ;;  %v3929_v62 = vld [vmem:[%s5840_s27 + $0x10] ss:$8 sps:$4 sm:$0xff]  }
  0x1c   :  { %1148 = vmatprep.subr.bf16.mxu1 %v3924_v58  ;;  %v3930_v63 = vld [vmem:[%s5840_s27 + $0x24] ss:$8 sps:$4 sm:$0xff]   ;;  %v3834_v0 = vld [vmem:[%s5838_s23 + $0x1b4] ss:$8 sps:$4 sm:$0xff]   ;;  %v3832_v1 = vld [vmem:[%s5838_s23 + $0x1b0] ss:$8 sps:$4 sm:$0xff]  }
  0x1d   :  { %1149 = vmatpush1.bf16.msra.mxu1 %v3926_v59  ;;  %v3932_v2 = vld [vmem:[%s5840_s27 + $0x20] ss:$8 sps:$4 sm:$0xff]   ;;  %v3933_v3 = vld [vmem:[%s5840_s27 + $0x34] ss:$8 sps:$4 sm:$0xff]   ;;  %v3837_v4 = vld [vmem:[%s5838_s23 + $0x1c4] ss:$8 sps:$4 sm:$0xff]  }
  0x1e   :  { %787 = vmatpush1.bf16.msra.mxu0 %v3766_v11  ;;  %1150 = vmatprep.subr.bf16.mxu1 %v3927_v60  ;;  %v3835_v5 = vld [vmem:[%s5838_s23 + $0x1c0] ss:$8 sps:$4 sm:$0xff]   ;;  %v3935_v6 = vld [vmem:[%s5840_s27 + $0x30] ss:$8 sps:$4 sm:$0xff]   ;;  %v3936_v7 = vld [vmem:[%s5840_s27 + $0x44] ss:$8 sps:$4 sm:$0xff]  }
  0x1f   :  { %788 = vmatprep.subr.bf16.mxu0 %v3767_v12  ;;  %v3840_v8 = vld [vmem:[%s5838_s23 + $0x1d4] ss:$8 sps:$4 sm:$0xff]   ;;  %v3838_v9 = vld [vmem:[%s5838_s23 + $0x1d0] ss:$8 sps:$4 sm:$0xff]   ;;  %v3938_v10 = vld [vmem:[%s5840_s27 + $0x40] ss:$8 sps:$4 sm:$0xff]  }
  0x20   :  { %v3939_v11 = vld [vmem:[%s5840_s27 + $0x54] ss:$8 sps:$4 sm:$0xff]   ;;  %v3843_v12 = vld [vmem:[%s5838_s23 + $0x1e4] ss:$8 sps:$4 sm:$0xff]   ;;  %v3941_v13 = vld [vmem:[%s5840_s27 + $0x50] ss:$8 sps:$4 sm:$0xff]  }
  0x21   :  { %1151 = vmatpush1.bf16.msra.mxu1 %v3929_v62  ;;  %v3841_v14 = vld [vmem:[%s5838_s23 + $0x1e0] ss:$8 sps:$4 sm:$0xff]   ;;  %v3884_v58 = vld [vmem:[%s5838_s23 + $0x2b4] ss:$8 sps:$4 sm:$0xff]   ;;  %v3882_v59 = vld [vmem:[%s5838_s23 + $0x2b0] ss:$8 sps:$4 sm:$0xff]  }
  0x22   :  { %789 = vmatpush1.bf16.msra.mxu0 %v3769_v15  ;;  %1152 = vmatprep.subr.bf16.mxu1 %v3930_v63  ;;  %v3942_v15 = vld [vmem:[%s5840_s27 + $0x64] ss:$8 sps:$4 sm:$0xff]   ;;  %v3890_v62 = vld [vmem:[%s5838_s23 + $0x2d4] ss:$8 sps:$4 sm:$0xff]   ;;  %v3888_v63 = vld [vmem:[%s5838_s23 + $0x2d0] ss:$8 sps:$4 sm:$0xff]  }
  0x23   :  { %790 = vmatprep.subr.bf16.mxu0 %v3770_v16  ;;  %v3846_v16 = vld [vmem:[%s5838_s23 + $0x1f4] ss:$8 sps:$4 sm:$0xff]   ;;  %v3887_v60 = vld [vmem:[%s5838_s23 + $0x2c4] ss:$8 sps:$4 sm:$0xff]  }
  0x25   :  { %1153 = vmatpush1.bf16.msra.mxu1 %v3932_v2  ;;  %v3896_v2 = vld [vmem:[%s5838_s23 + $0x2f4] ss:$8 sps:$4 sm:$0xff]  }
  0x26   :  { %791 = vmatpush1.bf16.msra.mxu0 %v3772_v17  ;;  %1154 = vmatprep.subr.bf16.mxu1 %v3933_v3  ;;  %v3944_v17 = vld [vmem:[%s5840_s27 + $0x60] ss:$8 sps:$4 sm:$0xff]   ;;  %v3894_v3 = vld [vmem:[%s5838_s23 + $0x2f0] ss:$8 sps:$4 sm:$0xff]  }
  0x27   :  { %792 = vmatprep.subr.bf16.mxu0 %v3773_v18  ;;  %v3844_v18 = vld [vmem:[%s5838_s23 + $0x1f0] ss:$8 sps:$4 sm:$0xff]  }
  0x29   :  { %1155 = vmatpush1.bf16.msra.mxu1 %v3935_v6  ;;  %v3899_v6 = vld [vmem:[%s5838_s23 + $0x300] ss:$8 sps:$4 sm:$0xff]  }
  0x2a   :  { %793 = vmatpush1.bf16.msra.mxu0 %v3775_v19  ;;  %1156 = vmatprep.subr.bf16.mxu1 %v3936_v7  ;;  %v3945_v19 = vld [vmem:[%s5840_s27 + $0x74] ss:$8 sps:$4 sm:$0xff]  }
  0x2b   :  { %794 = vmatprep.subr.bf16.mxu0 %v3776_v20  ;;  %v3851_v20 = vld [vmem:[%s5838_s23 + $0x204] ss:$8 sps:$4 sm:$0xff]   ;;  %v3904_v7 = vld [vmem:[%s5838_s23 + $0x314] ss:$8 sps:$4 sm:$0xff]  }
  0x2d   :  { %1157 = vmatpush1.bf16.msra.mxu1 %v3938_v10  ;;  %v3907_v10 = vld [vmem:[%s5838_s23 + $0x324] ss:$8 sps:$4 sm:$0xff]  }
  0x2e   :  { %795 = vmatpush1.bf16.msra.mxu0 %v3778_v21  ;;  %1158 = vmatprep.subr.bf16.mxu1 %v3939_v11  ;;  %v4737_v21 = vld [vmem:[%s5839_s0 + $0x10] sm:$0xff]  ;;  %v3905_v11 = vld [vmem:[%s5838_s23 + $0x320] ss:$8 sps:$4 sm:$0xff]  }
  0x2f   :  { %796 = vmatprep.subr.bf16.mxu0 %v3779_v22  ;;  %v3307_v22 = vcombine.low %v4589_v35, %v4589_v35  ;;  %v3860_v35 = vld [vmem:[%s5838_s23 + $0x234] ss:$8 sps:$4 sm:$0xff]  }
  0x31   :  { %1159 = vmatpush1.bf16.msra.mxu1 %v3941_v13  ;;  %v3908_v13 = vld [vmem:[%s5838_s23 + $0x330] ss:$8 sps:$4 sm:$0xff]  }
  0x32   :  { %797 = vmatpush1.bf16.msra.mxu0 %v3781_v23  ;;  %1160 = vmatprep.subr.bf16.mxu1 %v3942_v15  ;;  %v3947_v23 = vld [vmem:[%s5840_s27 + $0x70] ss:$8 sps:$4 sm:$0xff]   ;;  %v3911_v15 = vld [vmem:[%s5838_s23 + $0x340] ss:$8 sps:$4 sm:$0xff]  }
  0x33   :  { %798 = vmatprep.subr.bf16.mxu0 %v3782_v24  ;;  %v3849_v24 = vld [vmem:[%s5838_s23 + $0x200] ss:$8 sps:$4 sm:$0xff]  }
  0x35   :  { %1161 = vmatpush1.bf16.msra.mxu1 %v3944_v17  ;;  %v3914_v17 = vld [vmem:[%s5838_s23 + $0x350] ss:$8 sps:$4 sm:$0xff]  }
  0x36   :  { %799 = vmatpush1.bf16.msra.mxu0 %v3784_v25  ;;  %v3310_v25 = vcombine.high %v4737_v21, %v4737_v21  ;;  %1162 = vmatprep.subr.bf16.mxu1 %v3945_v19  ;;  %v3917_v19 = vld [vmem:[%s5838_s23 + $0x360] ss:$8 sps:$4 sm:$0xff]  }
  0x37   :  { %800 = vmatprep.subr.bf16.mxu0 %v3785_v26  ;;  %v3854_v26 = vld [vmem:[%s5838_s23 + $0x214] ss:$8 sps:$4 sm:$0xff]  }
  0x39   :  { %1163 = vmatpush1.bf16.msra.mxu1 %v3947_v23  ;;  %v3966_v23 = vld [vmem:[%s5840_s27 + $0xe4] ss:$8 sps:$4 sm:$0xff]  }
  0x3a   :  { %801 = vmatpush1.bf16.msra.mxu0 %v3787_v27  ;;  %v3948_v27 = vld [vmem:[%s5840_s27 + $0x84] ss:$8 sps:$4 sm:$0xff]  }
  0x3b   :  { %802 = vmatprep.subr.bf16.mxu0 %v3788_v28  ;;  %v3950_v28 = vld [vmem:[%s5840_s27 + $0x80] ss:$8 sps:$4 sm:$0xff]   ;;  %1164 = vmatprep.subr.bf16.mxu1 %v3948_v27  ;;  %v3974_v27 = vld [vmem:[%s5841_s2 + $0x4] ss:$8 sps:$4 sm:$0xff]  }
  0x3d   :  { %1165 = vmatpush1.bf16.msra.mxu1 %v3950_v28  ;;  %v181_v28 = vlaneseq }
  0x3e   :  { %803 = vmatpush1.bf16.msra.mxu0 %v3790_v29  ;;  %v3852_v29 = vld [vmem:[%s5838_s23 + $0x210] ss:$8 sps:$4 sm:$0xff]  }
  0x3f   :  { %804 = vmatprep.subr.bf16.mxu0 %v3791_v30  ;;  %v3951_v30 = vld [vmem:[%s5840_s27 + $0x94] ss:$8 sps:$4 sm:$0xff]  }
  0x40   :  { %1166 = vmatprep.subr.bf16.mxu1 %v3951_v30 }
  0x42   :  { %805 = vmatpush1.bf16.msra.mxu0 %v3793_v31  ;;  %v3857_v31 = vld [vmem:[%s5838_s23 + $0x224] ss:$8 sps:$4 sm:$0xff]  }
  0x43   :  { %806 = vmatprep.subr.bf16.mxu0 %v3794_v32  ;;  %v3953_v32 = vld [vmem:[%s5840_s27 + $0x90] ss:$8 sps:$4 sm:$0xff]  }
  0x44   :  { %1167 = vmatpush1.bf16.msra.mxu1 %v3953_v32 }
  0x46   :  { %807 = vmatpush1.bf16.msra.mxu0 %v3796_v33  ;;  %v3855_v33 = vld [vmem:[%s5838_s23 + $0x220] ss:$8 sps:$4 sm:$0xff]  }
  0x47   :  { %817 = vmatprep.subr.bf16.mxu0 %v3801_v34  ;;  %v3954_v34 = vld [vmem:[%s5840_s27 + $0xa4] ss:$8 sps:$4 sm:$0xff]  }
  0x48   :  { %1168 = vmatprep.subr.bf16.mxu1 %v3954_v34 }
  0x49   :  { %809 = vmatmul.mubr.bf16.vlgmr.msra.gmra.mrb[0].mxu0 %v3305_v36  ;;  %v3956_v36 = vld [vmem:[%s5840_s27 + $0xa0] ss:$8 sps:$4 sm:$0xff]  }
  0x4a   :  { %818 = vmatpush1.bf16.msra.mxu0 %v3799_v37  ;;  %849 = vmatprep.mubr.bf16.mxu0 %v3308_v38  ;;  %v3858_v37 = vld [vmem:[%s5838_s23 + $0x230] ss:$8 sps:$4 sm:$0xff]   ;;  %v3957_v38 = vld [vmem:[%s5840_s27 + $0xb4] ss:$8 sps:$4 sm:$0xff]  }
  0x4b   :  { %819 = vmatprep.subr.bf16.mxu0 %v3804_v39  ;;  %v3863_v39 = vld [vmem:[%s5838_s23 + $0x244] ss:$8 sps:$4 sm:$0xff]   ;;  %1169 = vmatpush1.bf16.msra.mxu1 %v3956_v36 }
  0x4c   :  { %1170 = vmatprep.subr.bf16.mxu1 %v3957_v38 }
  0x4e   :  { %820 = vmatpush1.bf16.msra.mxu0 %v3802_v40  ;;  %v3959_v40 = vld [vmem:[%s5840_s27 + $0xb0] ss:$8 sps:$4 sm:$0xff]  }
  0x4f   :  { %821 = vmatprep.subr.bf16.mxu0 %v3807_v41  ;;  %v3861_v41 = vld [vmem:[%s5838_s23 + $0x240] ss:$8 sps:$4 sm:$0xff]   ;;  %1171 = vmatpush1.bf16.msra.mxu1 %v3959_v40 }
  0x52   :  { %822 = vmatpush1.bf16.msra.mxu0 %v3805_v42  ;;  %v3960_v42 = vld [vmem:[%s5840_s27 + $0xc4] ss:$8 sps:$4 sm:$0xff]  }
  0x53   :  { %823 = vmatprep.subr.bf16.mxu0 %v3810_v43  ;;  %v3866_v43 = vld [vmem:[%s5838_s23 + $0x254] ss:$8 sps:$4 sm:$0xff]   ;;  %1172 = vmatprep.subr.bf16.mxu1 %v3960_v42 }
  0x56   :  { %824 = vmatpush1.bf16.msra.mxu0 %v3808_v44  ;;  %v3962_v44 = vld [vmem:[%s5840_s27 + $0xc0] ss:$8 sps:$4 sm:$0xff]  }
  0x57   :  { %825 = vmatprep.subr.bf16.mxu0 %v3813_v45  ;;  %v3864_v45 = vld [vmem:[%s5838_s23 + $0x250] ss:$8 sps:$4 sm:$0xff]   ;;  %1173 = vmatpush1.bf16.msra.mxu1 %v3962_v44  ;;  %v3972_v44 = vld [vmem:[%s5841_s2] ss:$8 sps:$4 sm:$0xff]  }
  0x5a   :  { %826 = vmatpush1.bf16.msra.mxu0 %v3811_v46  ;;  %v3963_v46 = vld [vmem:[%s5840_s27 + $0xd4] ss:$8 sps:$4 sm:$0xff]  }
  0x5b   :  { %827 = vmatprep.subr.bf16.mxu0 %v3816_v47  ;;  %v3869_v47 = vld [vmem:[%s5838_s23 + $0x264] ss:$8 sps:$4 sm:$0xff]   ;;  %1174 = vmatprep.subr.bf16.mxu1 %v3963_v46  ;;  %v3977_v46 = vld [vmem:[%s5841_s2 + $0x14] ss:$8 sps:$4 sm:$0xff]  }
  0x5e   :  { %828 = vmatpush1.bf16.msra.mxu0 %v3814_v48  ;;  %v3965_v48 = vld [vmem:[%s5840_s27 + $0xd0] ss:$8 sps:$4 sm:$0xff]  }
  0x5f   :  { %829 = vmatprep.subr.bf16.mxu0 %v3819_v49  ;;  %v3867_v49 = vld [vmem:[%s5838_s23 + $0x260] ss:$8 sps:$4 sm:$0xff]   ;;  %1175 = vmatpush1.bf16.msra.mxu1 %v3965_v48  ;;  %v3980_v48 = vld [vmem:[%s5841_s2 + $0x24] ss:$8 sps:$4 sm:$0xff]  }
  0x60   :  { %1176 = vmatprep.subr.bf16.mxu1 %v3966_v23 }
  0x62   :  { %830 = vmatpush1.bf16.msra.mxu0 %v3817_v50  ;;  %v3872_v50 = vld [vmem:[%s5838_s23 + $0x274] ss:$8 sps:$4 sm:$0xff]  }
  0x63   :  { %831 = vmatprep.subr.bf16.mxu0 %v3822_v51  ;;  %v3870_v51 = vld [vmem:[%s5838_s23 + $0x270] ss:$8 sps:$4 sm:$0xff]  }
  0x66   :  { %832 = vmatpush1.bf16.msra.mxu0 %v3820_v52  ;;  %v3875_v52 = vld [vmem:[%s5838_s23 + $0x284] ss:$8 sps:$4 sm:$0xff]  }
  0x67   :  { %833 = vmatprep.subr.bf16.mxu0 %v3825_v53  ;;  %v3873_v53 = vld [vmem:[%s5838_s23 + $0x280] ss:$8 sps:$4 sm:$0xff]  }
  0x6a   :  { %834 = vmatpush1.bf16.msra.mxu0 %v3823_v54  ;;  %v3878_v54 = vld [vmem:[%s5838_s23 + $0x294] ss:$8 sps:$4 sm:$0xff]  }
  0x6b   :  { %835 = vmatprep.subr.bf16.mxu0 %v3828_v55  ;;  %v3876_v55 = vld [vmem:[%s5838_s23 + $0x290] ss:$8 sps:$4 sm:$0xff]  }
  0x6e   :  { %836 = vmatpush1.bf16.msra.mxu0 %v3826_v56  ;;  %v3881_v56 = vld [vmem:[%s5838_s23 + $0x2a4] ss:$8 sps:$4 sm:$0xff]  }
  0x6f   :  { %837 = vmatprep.subr.bf16.mxu0 %v3831_v57  ;;  %v3879_v57 = vld [vmem:[%s5838_s23 + $0x2a0] ss:$8 sps:$4 sm:$0xff]  }
  0x72   :  { %838 = vmatpush1.bf16.msra.mxu0 %v3829_v61  ;;  %v3885_v61 = vld [vmem:[%s5838_s23 + $0x2c0] ss:$8 sps:$4 sm:$0xff]  }
  0x73   :  { %839 = vmatprep.subr.bf16.mxu0 %v3834_v0  ;;  %v3893_v0 = vld [vmem:[%s5838_s23 + $0x2e4] ss:$8 sps:$4 sm:$0xff]  }
  0x76   :  { %840 = vmatpush1.bf16.msra.mxu0 %v3832_v1  ;;  %v3891_v1 = vld [vmem:[%s5838_s23 + $0x2e0] ss:$8 sps:$4 sm:$0xff]  }
  0x77   :  { %841 = vmatprep.subr.bf16.mxu0 %v3837_v4  ;;  %v3901_v4 = vld [vmem:[%s5838_s23 + $0x304] ss:$8 sps:$4 sm:$0xff]  }
  0x7a   :  { %842 = vmatpush1.bf16.msra.mxu0 %v3835_v5  ;;  %v3309_v5 = vcombine.low %v4737_v21, %v4737_v21  ;;  %v3920_v21 = vld [vmem:[%s5838_s23 + $0x370] ss:$8 sps:$4 sm:$0xff]  }
  0x7b   :  { %843 = vmatprep.subr.bf16.mxu0 %v3840_v8  ;;  %v3902_v8 = vld [vmem:[%s5838_s23 + $0x310] ss:$8 sps:$4 sm:$0xff]  }
  0x7e   :  { %844 = vmatpush1.bf16.msra.mxu0 %v3838_v9  ;;  %v4378_v9 = vmov 0  }
  0x7f   :  { %845 = vmatprep.subr.bf16.mxu0 %v3843_v12  ;;  %v3910_v12 = vld [vmem:[%s5838_s23 + $0x334] ss:$8 sps:$4 sm:$0xff]  }
  0x82   :  { %846 = vmatpush1.bf16.msra.mxu0 %v3841_v14  ;;  %v3913_v14 = vld [vmem:[%s5838_s23 + $0x344] ss:$8 sps:$4 sm:$0xff]  }
  0x83   :  { %847 = vmatprep.subr.bf16.mxu0 %v3846_v16  ;;  %v3916_v16 = vld [vmem:[%s5838_s23 + $0x354] ss:$8 sps:$4 sm:$0xff]  }
  0x86   :  { %848 = vmatpush1.bf16.msra.mxu0 %v3844_v18  ;;  %v3919_v18 = vld [vmem:[%s5838_s23 + $0x364] ss:$8 sps:$4 sm:$0xff]  }
  0x87   :  { %858 = vmatprep.subr.bf16.mxu0 %v3851_v20  ;;  %v3922_v20 = vld [vmem:[%s5838_s23 + $0x374] ss:$8 sps:$4 sm:$0xff]  }
  0x89   :  { %850 = vmatmul.mubr.bf16.vlgmr.msra.gmra.mrb[0].mxu0 %v3307_v22  ;;  %v3923_v22 = vld [vmem:[%s5839_s0 + $0x18] ss:$0 sps:$4 sm:$0xff]  }
  0x8a   :  { %859 = vmatpush1.bf16.msra.mxu0 %v3849_v24  ;;  %890 = vmatprep.mubr.bf16.mxu0 %v3310_v25  ;;  %v3968_v24 = vld [vmem:[%s5840_s27 + $0xe0] ss:$8 sps:$4 sm:$0xff]   ;;  %v3969_v25 = vld [vmem:[%s5840_s27 + $0xf4] ss:$8 sps:$4 sm:$0xff]  }
  0x8b   :  { %860 = vmatprep.subr.bf16.mxu0 %v3854_v26  ;;  %1177 = vmatpush1.bf16.msra.mxu1 %v3968_v24  ;;  %v3971_v26 = vld [vmem:[%s5840_s27 + $0xf0] ss:$8 sps:$4 sm:$0xff]  }
  0x8c   :  { %1178 = vmatprep.subr.bf16.mxu1 %v3969_v25 }
  0x8e   :  { %861 = vmatpush1.bf16.msra.mxu0 %v3852_v29  ;;  %v4944_v29 = vshrl.u32 %v181_v28, 7  ;;  %v4025_v28 = vld [vmem:[%s5813_s8 + $0x14] ss:$8 sps:$4 sm:$0xff]  }
  0x8f   :  { %862 = vmatprep.subr.bf16.mxu0 %v3857_v31  ;;  %1179 = vmatpush1.bf16.msra.mxu1 %v3971_v26  ;;  %v179_v31 = vld [vmem:[%s5842_s24] sm:$0x3] }
  0x90   :  { %1397 = vmatprep.subr.bf16.mxu1 %v3974_v27  ;;  %v4947_v30 = vsub.s32 0, %v4944_v29  ;;  %v4953_v32 = vsub.s32 1, %v4944_v29  ;;  %v4020_v26 = vld [vmem:[%s5813_s8] ss:$8 sps:$4 sm:$0xff]  }
  0x92   :  { %863 = vmatpush1.bf16.msra.mxu0 %v3855_v33  ;;  %v184_v33 = vrot.slane %v179_v31, %v4947_v30  ;;  %v188_v34 = vrot.slane %v179_v31, %v4953_v32  ;;  %v4023_v31 = vld [vmem:[%s5813_s8 + $0x10] ss:$8 sps:$4 sm:$0xff]  }
  0x93   :  { %864 = vmatprep.subr.bf16.mxu0 %v3860_v35 }
  0x96   :  { %865 = vmatpush1.bf16.msra.mxu0 %v3858_v37 }
  0x97   :  { %866 = vmatprep.subr.bf16.mxu0 %v3863_v39 }
  0x9a   :  { %867 = vmatpush1.bf16.msra.mxu0 %v3861_v41 }
  0x9b   :  { %868 = vmatprep.subr.bf16.mxu0 %v3866_v43 }
  0x9e   :  { %869 = vmatpush1.bf16.msra.mxu0 %v3864_v45 }
  0x9f   :  { %870 = vmatprep.subr.bf16.mxu0 %v3869_v47  ;;  %v3975_v47 = vld [vmem:[%s5841_s2 + $0x10] ss:$8 sps:$4 sm:$0xff]  }
  0xa2   :  { %871 = vmatpush1.bf16.msra.mxu0 %v3867_v49  ;;  %v3978_v49 = vld [vmem:[%s5841_s2 + $0x20] ss:$8 sps:$4 sm:$0xff]  }
  0xa3   :  { %872 = vmatprep.subr.bf16.mxu0 %v3872_v50  ;;  %v3983_v50 = vld [vmem:[%s5841_s2 + $0x34] ss:$8 sps:$4 sm:$0xff]  }
  0xa6   :  { %873 = vmatpush1.bf16.msra.mxu0 %v3870_v51  ;;  %v3981_v51 = vld [vmem:[%s5841_s2 + $0x30] ss:$8 sps:$4 sm:$0xff]  }
  0xa7   :  { %874 = vmatprep.subr.bf16.mxu0 %v3875_v52  ;;  %v3986_v52 = vld [vmem:[%s5841_s2 + $0x44] ss:$8 sps:$4 sm:$0xff]  }
  0xaa   :  { %875 = vmatpush1.bf16.msra.mxu0 %v3873_v53  ;;  %v3984_v53 = vld [vmem:[%s5841_s2 + $0x40] ss:$8 sps:$4 sm:$0xff]  }
  0xab   :  { %876 = vmatprep.subr.bf16.mxu0 %v3878_v54  ;;  %v3989_v54 = vld [vmem:[%s5841_s2 + $0x54] ss:$8 sps:$4 sm:$0xff]  }
  0xae   :  { %877 = vmatpush1.bf16.msra.mxu0 %v3876_v55  ;;  %v3987_v55 = vld [vmem:[%s5841_s2 + $0x50] ss:$8 sps:$4 sm:$0xff]  }
  0xaf   :  { %878 = vmatprep.subr.bf16.mxu0 %v3881_v56  ;;  %v3992_v56 = vld [vmem:[%s5841_s2 + $0x64] ss:$8 sps:$4 sm:$0xff]  }
  0xb2   :  { %879 = vmatpush1.bf16.msra.mxu0 %v3879_v57  ;;  %v3990_v57 = vld [vmem:[%s5841_s2 + $0x60] ss:$8 sps:$4 sm:$0xff]  }
  0xb3   :  { %880 = vmatprep.subr.bf16.mxu0 %v3884_v58  ;;  %v3995_v58 = vld [vmem:[%s5841_s2 + $0x74] ss:$8 sps:$4 sm:$0xff]  }
  0xb6   :  { %881 = vmatpush1.bf16.msra.mxu0 %v3882_v59  ;;  %v3993_v59 = vld [vmem:[%s5841_s2 + $0x70] ss:$8 sps:$4 sm:$0xff]  }
  0xb7   :  { %882 = vmatprep.subr.bf16.mxu0 %v3887_v60  ;;  %v3998_v60 = vld [vmem:[%s5841_s2 + $0x84] ss:$8 sps:$4 sm:$0xff]  }
  0xba   :  { %883 = vmatpush1.bf16.msra.mxu0 %v3885_v61  ;;  %v3996_v61 = vld [vmem:[%s5841_s2 + $0x80] ss:$8 sps:$4 sm:$0xff]  }
  0xbb   :  { %884 = vmatprep.subr.bf16.mxu0 %v3890_v62  ;;  %v4001_v62 = vld [vmem:[%s5841_s2 + $0x94] ss:$8 sps:$4 sm:$0xff]  }
  0xbe   :  { %885 = vmatpush1.bf16.msra.mxu0 %v3888_v63  ;;  %v3999_v63 = vld [vmem:[%s5841_s2 + $0x90] ss:$8 sps:$4 sm:$0xff]  }
  0xbf   :  { %886 = vmatprep.subr.bf16.mxu0 %v3893_v0  ;;  %v4004_v0 = vld [vmem:[%s5841_s2 + $0xa4] ss:$8 sps:$4 sm:$0xff]  }
  0xc2   :  { %887 = vmatpush1.bf16.msra.mxu0 %v3891_v1  ;;  %v4002_v1 = vld [vmem:[%s5841_s2 + $0xa0] ss:$8 sps:$4 sm:$0xff]  }
  0xc3   :  { %888 = vmatprep.subr.bf16.mxu0 %v3896_v2  ;;  %v4007_v2 = vld [vmem:[%s5841_s2 + $0xb4] ss:$8 sps:$4 sm:$0xff]  }
  0xc6   :  { %889 = vmatpush1.bf16.msra.mxu0 %v3894_v3  ;;  %v4005_v3 = vld [vmem:[%s5841_s2 + $0xb0] ss:$8 sps:$4 sm:$0xff]  }
  0xc7   :  { %899 = vmatprep.subr.bf16.mxu0 %v3901_v4  ;;  %v4010_v4 = vld [vmem:[%s5841_s2 + $0xc4] ss:$8 sps:$4 sm:$0xff]  }
  0xc9   :  { %891 = vmatmul.mubr.bf16.vlgmr.msra.gmra.mrb[0].mxu0 %v3309_v5  ;;  %v4008_v5 = vld [vmem:[%s5841_s2 + $0xc0] ss:$8 sps:$4 sm:$0xff]  }
  0xca   :  { %900 = vmatpush1.bf16.msra.mxu0 %v3899_v6  ;;  %931 = vmatprep.mubr.bf16.mxu0 %v4378_v9  ;;  %v4013_v6 = vld [vmem:[%s5841_s2 + $0xd4] ss:$8 sps:$4 sm:$0xff]  }
  0xcb   :  { %901 = vmatprep.subr.bf16.mxu0 %v3904_v7  ;;  %v4011_v7 = vld [vmem:[%s5841_s2 + $0xd0] ss:$8 sps:$4 sm:$0xff]  }
  0xce   :  { %902 = vmatpush1.bf16.msra.mxu0 %v3902_v8  ;;  %v4016_v8 = vld [vmem:[%s5841_s2 + $0xe4] ss:$8 sps:$4 sm:$0xff]  }
  0xcf   :  { %903 = vmatprep.subr.bf16.mxu0 %v3907_v10  ;;  %v4014_v10 = vld [vmem:[%s5841_s2 + $0xe0] ss:$8 sps:$4 sm:$0xff]  }
  0xd2   :  { %904 = vmatpush1.bf16.msra.mxu0 %v3905_v11  ;;  %v4019_v11 = vld [vmem:[%s5841_s2 + $0xf4] ss:$8 sps:$4 sm:$0xff]  }
  0xd3   :  { %905 = vmatprep.subr.bf16.mxu0 %v3910_v12  ;;  %v4017_v12 = vld [vmem:[%s5841_s2 + $0xf0] ss:$8 sps:$4 sm:$0xff]  }
  0xd6   :  { %906 = vmatpush1.bf16.msra.mxu0 %v3908_v13  ;;  %v4022_v13 = vld [vmem:[%s5813_s8 + $0x4] ss:$8 sps:$4 sm:$0xff]  }
  0xd7   :  { %907 = vmatprep.subr.bf16.mxu0 %v3913_v14  ;;  %v976_v14 = vld [vmem:[%s5814_s5] sm:$0x3] }
  0xda   :  { %908 = vmatpush1.bf16.msra.mxu0 %v3911_v15  ;;  %v981_v15 = vrot.slane %v976_v14, %v4947_v30 }
  0xdb   :  { %909 = vmatprep.subr.bf16.mxu0 %v3916_v16  ;;  %v985_v16 = vrot.slane %v976_v14, %v4953_v32  ;;  %v4071_v14 = vld [vmem:[%s5815_s10 + $0x10] ss:$8 sps:$4 sm:$0xff]  }
  0xde   :  { %910 = vmatpush1.bf16.msra.mxu0 %v3914_v17 }
  0xdf   :  { %911 = vmatprep.subr.bf16.mxu0 %v3919_v18 }
  0xe2   :  { %912 = vmatpush1.bf16.msra.mxu0 %v3917_v19 }
  0xe3   :  { %913 = vmatprep.subr.bf16.mxu0 %v3922_v20 }
  0xe6   :  { %914 = vmatpush1.bf16.msra.mxu0 %v3920_v21 }
  0xe9   :  { %932 = vmatmul.mubr.bf16.vlgmr.msra.gmra.mrb[0].mxu0 %v3923_v22 }
 0x1bc   :  { %v933_v35 = vpop.f32.mrb[0].mxu0 }
 0x1bd   :  { %v3734_v36 = vadd.f32 %v933_v35, %v184_v33  ;;  %v935_v37 = vpop.f32.mrb[1].mxu0  ;;  %v4028_v33 = vld [vmem:[%s5813_s8 + $0x24] ss:$8 sps:$4 sm:$0xff]   ;;  %v4031_v35 = vld [vmem:[%s5813_s8 + $0x34] ss:$8 sps:$4 sm:$0xff]  }
 0x1be   :  { %v3735_v38 = vadd.f32 %v935_v37, %v188_v34  ;;  %v937_v39 = vpop.f32.mrb[2].mxu0  ;;  %v4026_v34 = vld [vmem:[%s5813_s8 + $0x20] ss:$8 sps:$4 sm:$0xff]   ;;  %v4034_v37 = vld [vmem:[%s5813_s8 + $0x44] ss:$8 sps:$4 sm:$0xff]  }
 0x1bf   :  { %v940_v40 = vmax.f32 %v3734_v36, 0.0  ;;  %v938_v41 = vpop.f32.mrb[3].mxu0  ;;  %v4029_v36 = vld [vmem:[%s5813_s8 + $0x30] ss:$8 sps:$4 sm:$0xff]   ;;  %v4037_v39 = vld [vmem:[%s5813_s8 + $0x54] ss:$8 sps:$4 sm:$0xff]  }
 0x1c0   :  { %v941_v42 = vmax.f32 %v3735_v38, 0.0  ;;  %v4032_v38 = vld [vmem:[%s5813_s8 + $0x40] ss:$8 sps:$4 sm:$0xff]   ;;  %v4040_v41 = vld [vmem:[%s5813_s8 + $0x64] ss:$8 sps:$4 sm:$0xff]  }
 0x1c1   :  { %v942_v45 = vpack.c.bf16 %v940_v40, %v940_v40  ;;  %v4035_v40 = vld [vmem:[%s5813_s8 + $0x50] ss:$8 sps:$4 sm:$0xff]  }
 0x1c2   :  { %v943_v43 = vpack.c.bf16 %v941_v42, %v941_v42  ;;  %v4038_v42 = vld [vmem:[%s5813_s8 + $0x60] ss:$8 sps:$4 sm:$0xff]  }
 0x1c4   :  { %1180 = vmatprep.mubr.bf16.mxu1 %v943_v43  ;;  %v4043_v43 = vld [vmem:[%s5813_s8 + $0x74] ss:$8 sps:$4 sm:$0xff]  }
 0x1c5   :  { %1181 = vmatmul.mubr.bf16.vlgmr.msra.gmra.mrb[0].mxu1 %v942_v45  ;;  %v4046_v45 = vld [vmem:[%s5813_s8 + $0x84] ss:$8 sps:$4 sm:$0xff]  }
 0x1c6   :  { %1398 = vmatpush1.bf16.msra.mxu1 %v3972_v44  ;;  %v4041_v44 = vld [vmem:[%s5813_s8 + $0x70] ss:$8 sps:$4 sm:$0xff]  }
 0x1c7   :  { %1399 = vmatprep.subr.bf16.mxu1 %v3977_v46  ;;  %v4044_v46 = vld [vmem:[%s5813_s8 + $0x80] ss:$8 sps:$4 sm:$0xff]  }
 0x1ca   :  { %1400 = vmatpush1.bf16.msra.mxu1 %v3975_v47  ;;  %v4049_v47 = vld [vmem:[%s5813_s8 + $0x94] ss:$8 sps:$4 sm:$0xff]  }
 0x1cb   :  { %1401 = vmatprep.subr.bf16.mxu1 %v3980_v48  ;;  %v4047_v48 = vld [vmem:[%s5813_s8 + $0x90] ss:$8 sps:$4 sm:$0xff]  }
 0x1ce   :  { %1402 = vmatpush1.bf16.msra.mxu1 %v3978_v49  ;;  %v4052_v49 = vld [vmem:[%s5813_s8 + $0xa4] ss:$8 sps:$4 sm:$0xff]  }
 0x1cf   :  { %1403 = vmatprep.subr.bf16.mxu1 %v3983_v50  ;;  %v4050_v50 = vld [vmem:[%s5813_s8 + $0xa0] ss:$8 sps:$4 sm:$0xff]  }
 0x1d2   :  { %1404 = vmatpush1.bf16.msra.mxu1 %v3981_v51  ;;  %v4055_v51 = vld [vmem:[%s5813_s8 + $0xb4] ss:$8 sps:$4 sm:$0xff]  }
 0x1d3   :  { %1405 = vmatprep.subr.bf16.mxu1 %v3986_v52  ;;  %v4053_v52 = vld [vmem:[%s5813_s8 + $0xb0] ss:$8 sps:$4 sm:$0xff]  }
 0x1d6   :  { %1406 = vmatpush1.bf16.msra.mxu1 %v3984_v53  ;;  %v4058_v53 = vld [vmem:[%s5813_s8 + $0xc4] ss:$8 sps:$4 sm:$0xff]  }
 0x1d7   :  { %1407 = vmatprep.subr.bf16.mxu1 %v3989_v54  ;;  %v4056_v54 = vld [vmem:[%s5813_s8 + $0xc0] ss:$8 sps:$4 sm:$0xff]  }
 0x1da   :  { %1408 = vmatpush1.bf16.msra.mxu1 %v3987_v55  ;;  %v4061_v55 = vld [vmem:[%s5813_s8 + $0xd4] ss:$8 sps:$4 sm:$0xff]  }
 0x1db   :  { %1409 = vmatprep.subr.bf16.mxu1 %v3992_v56  ;;  %v4059_v56 = vld [vmem:[%s5813_s8 + $0xd0] ss:$8 sps:$4 sm:$0xff]  }
 0x1de   :  { %1410 = vmatpush1.bf16.msra.mxu1 %v3990_v57  ;;  %v4064_v57 = vld [vmem:[%s5813_s8 + $0xe4] ss:$8 sps:$4 sm:$0xff]  }
 0x1df   :  { %1411 = vmatprep.subr.bf16.mxu1 %v3995_v58  ;;  %v4062_v58 = vld [vmem:[%s5813_s8 + $0xe0] ss:$8 sps:$4 sm:$0xff]  }
 0x1e2   :  { %1412 = vmatpush1.bf16.msra.mxu1 %v3993_v59  ;;  %v4067_v59 = vld [vmem:[%s5813_s8 + $0xf4] ss:$8 sps:$4 sm:$0xff]  }
 0x1e3   :  { %1413 = vmatprep.subr.bf16.mxu1 %v3998_v60  ;;  %v4065_v60 = vld [vmem:[%s5813_s8 + $0xf0] ss:$8 sps:$4 sm:$0xff]  }
 0x1e6   :  { %1414 = vmatpush1.bf16.msra.mxu1 %v3996_v61  ;;  %v4070_v61 = vld [vmem:[%s5815_s10 + $0x4] ss:$8 sps:$4 sm:$0xff]  }
 0x1e7   :  { %1415 = vmatprep.subr.bf16.mxu1 %v4001_v62  ;;  %v1225_v62 = vld [vmem:[%s5816_s7] sm:$0x3] }
 0x1ea   :  { %1416 = vmatpush1.bf16.msra.mxu1 %v3999_v63  ;;  %v1230_v63 = vrot.slane %v1225_v62, %v4947_v30 }
 0x1eb   :  { %1417 = vmatprep.subr.bf16.mxu1 %v4004_v0  ;;  %v1234_v0 = vrot.slane %v1225_v62, %v4953_v32 }
 0x1ee   :  { %1418 = vmatpush1.bf16.msra.mxu1 %v4002_v1 }
 0x1ef   :  { %1419 = vmatprep.subr.bf16.mxu1 %v4007_v2 }
 0x1f2   :  { %1420 = vmatpush1.bf16.msra.mxu1 %v4005_v3 }
 0x1f3   :  { %1421 = vmatprep.subr.bf16.mxu1 %v4010_v4 }
 0x1f6   :  { %1422 = vmatpush1.bf16.msra.mxu1 %v4008_v5 }
 0x1f7   :  { %1423 = vmatprep.subr.bf16.mxu1 %v4013_v6 }
 0x1fa   :  { %1424 = vmatpush1.bf16.msra.mxu1 %v4011_v7 }
 0x1fb   :  { %1425 = vmatprep.subr.bf16.mxu1 %v4016_v8 }
 0x1fe   :  { %1426 = vmatpush1.bf16.msra.mxu1 %v4014_v10 }
 0x1ff   :  { %1427 = vmatprep.subr.bf16.mxu1 %v4019_v11  ;;  %v4068_v11 = vld [vmem:[%s5815_s10] ss:$8 sps:$4 sm:$0xff]  }
 0x202   :  { %1428 = vmatpush1.bf16.msra.mxu1 %v4017_v12 }
 0x203   :  { %1646 = vmatprep.subr.bf16.mxu1 %v4022_v13  ;;  %v4073_v13 = vld [vmem:[%s5815_s10 + $0x14] ss:$8 sps:$4 sm:$0xff]  }
 0x298   :  { %v1182_v17 = vpop.f32.mrb[0].mxu1 }
 0x299   :  { %v1183_v18 = vadd.f32 %v1182_v17, %v981_v15  ;;  %v1184_v19 = vpop.f32.mrb[1].mxu1  ;;  %v4076_v15 = vld [vmem:[%s5815_s10 + $0x24] ss:$8 sps:$4 sm:$0xff]   ;;  %v4079_v17 = vld [vmem:[%s5815_s10 + $0x34] ss:$8 sps:$4 sm:$0xff]  }
 0x29a   :  { %v1185_v20 = vadd.f32 %v1184_v19, %v985_v16  ;;  %v1186_v21 = vpop.f32.mrb[2].mxu1  ;;  %v4074_v16 = vld [vmem:[%s5815_s10 + $0x20] ss:$8 sps:$4 sm:$0xff]  }
 0x29b   :  { %v1189_v22 = vmax.f32 %v1183_v18, 0.0  ;;  %v1187_v23 = vpop.f32.mrb[3].mxu1  ;;  %v4082_v18 = vld [vmem:[%s5815_s10 + $0x44] ss:$8 sps:$4 sm:$0xff]   ;;  %v4080_v19 = vld [vmem:[%s5815_s10 + $0x40] ss:$8 sps:$4 sm:$0xff]  }
 0x29c   :  { %v1190_v24 = vmax.f32 %v1185_v20, 0.0  ;;  %v4085_v20 = vld [vmem:[%s5815_s10 + $0x54] ss:$8 sps:$4 sm:$0xff]   ;;  %v4083_v21 = vld [vmem:[%s5815_s10 + $0x50] ss:$8 sps:$4 sm:$0xff]  }
 0x29d   :  { %v1191_v27 = vpack.c.bf16 %v1189_v22, %v1189_v22  ;;  %v4088_v22 = vld [vmem:[%s5815_s10 + $0x64] ss:$8 sps:$4 sm:$0xff]   ;;  %v4086_v23 = vld [vmem:[%s5815_s10 + $0x60] ss:$8 sps:$4 sm:$0xff]  }
 0x29e   :  { %v1192_v25 = vpack.c.bf16 %v1190_v24, %v1190_v24  ;;  %v4091_v24 = vld [vmem:[%s5815_s10 + $0x74] ss:$8 sps:$4 sm:$0xff]  }
 0x2a0   :  { %1429 = vmatprep.mubr.bf16.mxu1 %v1192_v25  ;;  %v4089_v25 = vld [vmem:[%s5815_s10 + $0x70] ss:$8 sps:$4 sm:$0xff]  }
 0x2a1   :  { %1430 = vmatmul.mubr.bf16.vlgmr.msra.gmra.mrb[4].mxu1 %v1191_v27  ;;  %v4094_v27 = vld [vmem:[%s5817_s12 + $0x4] ss:$8 sps:$4 sm:$0xff]  }
 0x2a2   :  { %1647 = vmatpush1.bf16.msra.mxu1 %v4020_v26  ;;  %v4092_v26 = vld [vmem:[%s5817_s12] ss:$8 sps:$4 sm:$0xff]   ;;  %2051 = vmatprep.subr.bf16.mxu0 %v4094_v27  ;;  %v4163_v27 = vld [vmem:[%s5822_s14 + $0x74] ss:$8 sps:$4 sm:$0xff]  }
 0x2a3   :  { %1648 = vmatprep.subr.bf16.mxu1 %v4025_v28  ;;  %v4097_v28 = vld [vmem:[%s5817_s12 + $0x14] ss:$8 sps:$4 sm:$0xff]   ;;  %2052 = vmatpush1.bf16.msra.mxu0 %v4092_v26  ;;  %v4158_v26 = vld [vmem:[%s5822_s14 + $0x60] ss:$8 sps:$4 sm:$0xff]  }
 0x2a4   :  { %2053 = vmatprep.subr.bf16.mxu0 %v4097_v28  ;;  %v4161_v28 = vld [vmem:[%s5822_s14 + $0x70] ss:$8 sps:$4 sm:$0xff]  }
 0x2a6   :  { %1649 = vmatpush1.bf16.msra.mxu1 %v4023_v31  ;;  %v4095_v31 = vld [vmem:[%s5817_s12 + $0x10] ss:$8 sps:$4 sm:$0xff]  }
 0x2a7   :  { %1650 = vmatprep.subr.bf16.mxu1 %v4028_v33  ;;  %v4100_v33 = vld [vmem:[%s5817_s12 + $0x24] ss:$8 sps:$4 sm:$0xff]   ;;  %2054 = vmatpush1.bf16.msra.mxu0 %v4095_v31 }
 0x2a8   :  { %2055 = vmatprep.subr.bf16.mxu0 %v4100_v33  ;;  %v4166_v31 = vld [vmem:[%s5822_s14 + $0x84] ss:$8 sps:$4 sm:$0xff]   ;;  %v4164_v33 = vld [vmem:[%s5822_s14 + $0x80] ss:$8 sps:$4 sm:$0xff]  }
 0x2aa   :  { %1651 = vmatpush1.bf16.msra.mxu1 %v4026_v34  ;;  %v4098_v34 = vld [vmem:[%s5817_s12 + $0x20] ss:$8 sps:$4 sm:$0xff]  }
 0x2ab   :  { %1652 = vmatprep.subr.bf16.mxu1 %v4031_v35  ;;  %v4103_v35 = vld [vmem:[%s5817_s12 + $0x34] ss:$8 sps:$4 sm:$0xff]   ;;  %2056 = vmatpush1.bf16.msra.mxu0 %v4098_v34 }
 0x2ac   :  { %2057 = vmatprep.subr.bf16.mxu0 %v4103_v35  ;;  %v4169_v34 = vld [vmem:[%s5822_s14 + $0x94] ss:$8 sps:$4 sm:$0xff]   ;;  %v4167_v35 = vld [vmem:[%s5822_s14 + $0x90] ss:$8 sps:$4 sm:$0xff]  }
 0x2ae   :  { %1653 = vmatpush1.bf16.msra.mxu1 %v4029_v36  ;;  %v4101_v36 = vld [vmem:[%s5817_s12 + $0x30] ss:$8 sps:$4 sm:$0xff]  }
 0x2af   :  { %1654 = vmatprep.subr.bf16.mxu1 %v4034_v37  ;;  %v4106_v37 = vld [vmem:[%s5817_s12 + $0x44] ss:$8 sps:$4 sm:$0xff]   ;;  %2058 = vmatpush1.bf16.msra.mxu0 %v4101_v36 }
 0x2b0   :  { %2059 = vmatprep.subr.bf16.mxu0 %v4106_v37  ;;  %v4172_v36 = vld [vmem:[%s5822_s14 + $0xa4] ss:$8 sps:$4 sm:$0xff]   ;;  %v4170_v37 = vld [vmem:[%s5822_s14 + $0xa0] ss:$8 sps:$4 sm:$0xff]  }
 0x2b2   :  { %1655 = vmatpush1.bf16.msra.mxu1 %v4032_v38  ;;  %v4104_v38 = vld [vmem:[%s5817_s12 + $0x40] ss:$8 sps:$4 sm:$0xff]  }
 0x2b3   :  { %1656 = vmatprep.subr.bf16.mxu1 %v4037_v39  ;;  %v4109_v39 = vld [vmem:[%s5817_s12 + $0x54] ss:$8 sps:$4 sm:$0xff]   ;;  %2060 = vmatpush1.bf16.msra.mxu0 %v4104_v38 }
 0x2b4   :  { %2061 = vmatprep.subr.bf16.mxu0 %v4109_v39  ;;  %v4175_v38 = vld [vmem:[%s5822_s14 + $0xb4] ss:$8 sps:$4 sm:$0xff]   ;;  %v4173_v39 = vld [vmem:[%s5822_s14 + $0xb0] ss:$8 sps:$4 sm:$0xff]  }
 0x2b6   :  { %1657 = vmatpush1.bf16.msra.mxu1 %v4035_v40  ;;  %v4107_v40 = vld [vmem:[%s5817_s12 + $0x50] ss:$8 sps:$4 sm:$0xff]  }
 0x2b7   :  { %1658 = vmatprep.subr.bf16.mxu1 %v4040_v41  ;;  %v4112_v41 = vld [vmem:[%s5817_s12 + $0x64] ss:$8 sps:$4 sm:$0xff]   ;;  %2062 = vmatpush1.bf16.msra.mxu0 %v4107_v40 }
 0x2b8   :  { %2063 = vmatprep.subr.bf16.mxu0 %v4112_v41  ;;  %v4178_v40 = vld [vmem:[%s5822_s14 + $0xc4] ss:$8 sps:$4 sm:$0xff]   ;;  %v4176_v41 = vld [vmem:[%s5822_s14 + $0xc0] ss:$8 sps:$4 sm:$0xff]  }
 0x2ba   :  { %1659 = vmatpush1.bf16.msra.mxu1 %v4038_v42  ;;  %v4110_v42 = vld [vmem:[%s5817_s12 + $0x60] ss:$8 sps:$4 sm:$0xff]  }
 0x2bb   :  { %1660 = vmatprep.subr.bf16.mxu1 %v4043_v43  ;;  %v4115_v43 = vld [vmem:[%s5817_s12 + $0x74] ss:$8 sps:$4 sm:$0xff]   ;;  %2064 = vmatpush1.bf16.msra.mxu0 %v4110_v42 }
 0x2bc   :  { %2065 = vmatprep.subr.bf16.mxu0 %v4115_v43  ;;  %v4181_v42 = vld [vmem:[%s5822_s14 + $0xd4] ss:$8 sps:$4 sm:$0xff]   ;;  %v4179_v43 = vld [vmem:[%s5822_s14 + $0xd0] ss:$8 sps:$4 sm:$0xff]  }
 0x2be   :  { %1661 = vmatpush1.bf16.msra.mxu1 %v4041_v44  ;;  %v4113_v44 = vld [vmem:[%s5817_s12 + $0x70] ss:$8 sps:$4 sm:$0xff]  }
 0x2bf   :  { %1662 = vmatprep.subr.bf16.mxu1 %v4046_v45  ;;  %v4118_v45 = vld [vmem:[%s5817_s12 + $0x84] ss:$8 sps:$4 sm:$0xff]   ;;  %2066 = vmatpush1.bf16.msra.mxu0 %v4113_v44  ;;  %v1710_v44 = vld [vmem:[%s5823_s11] sm:$0x3] }
 0x2c0   :  { %2067 = vmatprep.subr.bf16.mxu0 %v4118_v45  ;;  %v1715_v45 = vrot.slane %v1710_v44, %v4947_v30 }
 0x2c2   :  { %1663 = vmatpush1.bf16.msra.mxu1 %v4044_v46  ;;  %v4116_v46 = vld [vmem:[%s5817_s12 + $0x80] ss:$8 sps:$4 sm:$0xff]  }
 0x2c3   :  { %1664 = vmatprep.subr.bf16.mxu1 %v4049_v47  ;;  %v4121_v47 = vld [vmem:[%s5817_s12 + $0x94] ss:$8 sps:$4 sm:$0xff]   ;;  %2068 = vmatpush1.bf16.msra.mxu0 %v4116_v46  ;;  %v1719_v46 = vrot.slane %v1710_v44, %v4953_v32 }
 0x2c4   :  { %2069 = vmatprep.subr.bf16.mxu0 %v4121_v47  ;;  %v4197_v44 = vld [vmem:[%s5824_s16 + $0x40] ss:$28 sps:$4 sm:$0xff]  }
 0x2c6   :  { %1665 = vmatpush1.bf16.msra.mxu1 %v4047_v48  ;;  %v4119_v48 = vld [vmem:[%s5817_s12 + $0x90] ss:$8 sps:$4 sm:$0xff]  }
 0x2c7   :  { %1666 = vmatprep.subr.bf16.mxu1 %v4052_v49  ;;  %v4124_v49 = vld [vmem:[%s5817_s12 + $0xa4] ss:$8 sps:$4 sm:$0xff]   ;;  %2070 = vmatpush1.bf16.msra.mxu0 %v4119_v48 }
 0x2c8   :  { %2071 = vmatprep.subr.bf16.mxu0 %v4124_v49 }
 0x2ca   :  { %1667 = vmatpush1.bf16.msra.mxu1 %v4050_v50  ;;  %v4122_v50 = vld [vmem:[%s5817_s12 + $0xa0] ss:$8 sps:$4 sm:$0xff]  }
 0x2cb   :  { %1668 = vmatprep.subr.bf16.mxu1 %v4055_v51  ;;  %v4127_v51 = vld [vmem:[%s5817_s12 + $0xb4] ss:$8 sps:$4 sm:$0xff]   ;;  %2072 = vmatpush1.bf16.msra.mxu0 %v4122_v50 }
 0x2cc   :  { %2073 = vmatprep.subr.bf16.mxu0 %v4127_v51 }
 0x2ce   :  { %1669 = vmatpush1.bf16.msra.mxu1 %v4053_v52  ;;  %v4125_v52 = vld [vmem:[%s5817_s12 + $0xb0] ss:$8 sps:$4 sm:$0xff]  }
 0x2cf   :  { %1670 = vmatprep.subr.bf16.mxu1 %v4058_v53  ;;  %v4130_v53 = vld [vmem:[%s5817_s12 + $0xc4] ss:$8 sps:$4 sm:$0xff]   ;;  %2074 = vmatpush1.bf16.msra.mxu0 %v4125_v52 }
 0x2d0   :  { %2075 = vmatprep.subr.bf16.mxu0 %v4130_v53 }
 0x2d2   :  { %1671 = vmatpush1.bf16.msra.mxu1 %v4056_v54  ;;  %v4128_v54 = vld [vmem:[%s5817_s12 + $0xc0] ss:$8 sps:$4 sm:$0xff]  }
 0x2d3   :  { %1672 = vmatprep.subr.bf16.mxu1 %v4061_v55  ;;  %v4133_v55 = vld [vmem:[%s5817_s12 + $0xd4] ss:$8 sps:$4 sm:$0xff]   ;;  %2076 = vmatpush1.bf16.msra.mxu0 %v4128_v54 }
 0x2d4   :  { %2077 = vmatprep.subr.bf16.mxu0 %v4133_v55 }
 0x2d6   :  { %1673 = vmatpush1.bf16.msra.mxu1 %v4059_v56  ;;  %v4131_v56 = vld [vmem:[%s5817_s12 + $0xd0] ss:$8 sps:$4 sm:$0xff]  }
 0x2d7   :  { %1674 = vmatprep.subr.bf16.mxu1 %v4064_v57  ;;  %2078 = vmatpush1.bf16.msra.mxu0 %v4131_v56  ;;  %v1474_v57 = vld [vmem:[%s5818_s9] sm:$0x3] }
 0x2da   :  { %1675 = vmatpush1.bf16.msra.mxu1 %v4062_v58  ;;  %v1479_v58 = vrot.slane %v1474_v57, %v4947_v30 }
 0x2db   :  { %1676 = vmatprep.subr.bf16.mxu1 %v4067_v59  ;;  %v1483_v59 = vrot.slane %v1474_v57, %v4953_v32  ;;  %v4184_v57 = vld [vmem:[%s5822_s14 + $0xe4] ss:$8 sps:$4 sm:$0xff]  }
 0x2de   :  { %1677 = vmatpush1.bf16.msra.mxu1 %v4065_v60 }
 0x2df   :  { %1802 = vmatprep.subr.bf16.mxu1 %v4070_v61 }
 0x374   :  { %v1431_v1 = vpop.f32.mrb[4].mxu1 }
 0x375   :  { %v1432_v2 = vadd.f32 %v1431_v1, %v1230_v63  ;;  %v1433_v3 = vpop.f32.mrb[5].mxu1 }
 0x376   :  { %v1434_v4 = vadd.f32 %v1433_v3, %v1234_v0  ;;  %v1435_v5 = vpop.f32.mrb[6].mxu1 }
 0x377   :  { %v1438_v6 = vmax.f32 %v1432_v2, 0.0  ;;  %v1436_v7 = vpop.f32.mrb[7].mxu1 }
 0x378   :  { %v1439_v8 = vmax.f32 %v1434_v4, 0.0  ;;  %v1690_v4 = vld [vmem:[%s5821_s1] sm:$0xff] }
 0x379   :  { %v1440_v12 = vpack.c.bf16 %v1438_v6, %v1438_v6 }
 0x37a   :  { %v1441_v10 = vpack.c.bf16 %v1439_v8, %v1439_v8 }
 0x37c   :  { %1678 = vmatprep.mubr.bf16.mxu1 %v1441_v10  ;;  %v4136_v10 = vld [vmem:[%s5817_s12 + $0xe4] ss:$8 sps:$4 sm:$0xff]  }
 0x37d   :  { %1679 = vmatmul.mubr.bf16.vlgmr.msra.gmra.mrb[8].mxu1 %v1440_v12  ;;  %2079 = vmatprep.subr.bf16.mxu0 %v4136_v10  ;;  %v4139_v12 = vld [vmem:[%s5817_s12 + $0xf4] ss:$8 sps:$4 sm:$0xff]  }
 0x37e   :  { %1803 = vmatpush1.bf16.msra.mxu1 %v4068_v11  ;;  %1834 = vmatprep.mubr.bf16.mxu1 %v4378_v9  ;;  %v4077_v9 = vld [vmem:[%s5815_s10 + $0x30] ss:$8 sps:$4 sm:$0xff]   ;;  %v4134_v11 = vld [vmem:[%s5817_s12 + $0xe0] ss:$8 sps:$4 sm:$0xff]  }
 0x37f   :  { %1804 = vmatprep.subr.bf16.mxu1 %v4073_v13  ;;  %2080 = vmatpush1.bf16.msra.mxu0 %v4134_v11  ;;  %v4137_v13 = vld [vmem:[%s5817_s12 + $0xf0] ss:$8 sps:$4 sm:$0xff]  }
 0x380   :  { %2081 = vmatprep.subr.bf16.mxu0 %v4139_v12  ;;  %v4218_v10 = vld [vmem:[%s5824_s16 + $0x118] ss:$28 sps:$4 sm:$0xff]   ;;  %v4224_v12 = vld [vmem:[%s5824_s16 + $0x150] ss:$28 sps:$4 sm:$0xff]  }
 0x381   :  { %v4226_v11 = vld [vmem:[%s5824_s16 + $0x154] ss:$28 sps:$4 sm:$0xff]  }
 0x382   :  { %1805 = vmatpush1.bf16.msra.mxu1 %v4071_v14  ;;  %v4140_v14 = vld [vmem:[%s5822_s14] ss:$8 sps:$4 sm:$0xff]  }
 0x383   :  { %1806 = vmatprep.subr.bf16.mxu1 %v4076_v15  ;;  %2082 = vmatpush1.bf16.msra.mxu0 %v4137_v13  ;;  %v4142_v15 = vld [vmem:[%s5822_s14 + $0x4] ss:$8 sps:$4 sm:$0xff]  }
 0x384   :  { %v4232_v13 = vld [vmem:[%s5824_s16 + $0x18c] ss:$28 sps:$4 sm:$0xff]  }
 0x386   :  { %1807 = vmatpush1.bf16.msra.mxu1 %v4074_v16  ;;  %v4145_v16 = vld [vmem:[%s5822_s14 + $0x14] ss:$8 sps:$4 sm:$0xff]  }
 0x387   :  { %1808 = vmatprep.subr.bf16.mxu1 %v4079_v17  ;;  %v4143_v17 = vld [vmem:[%s5822_s14 + $0x10] ss:$8 sps:$4 sm:$0xff]  }
 0x38a   :  { %1809 = vmatpush1.bf16.msra.mxu1 %v4077_v9  ;;  %v4148_v9 = vld [vmem:[%s5822_s14 + $0x24] ss:$8 sps:$4 sm:$0xff]  }
 0x38b   :  { %1810 = vmatprep.subr.bf16.mxu1 %v4082_v18  ;;  %v4146_v18 = vld [vmem:[%s5822_s14 + $0x20] ss:$8 sps:$4 sm:$0xff]  }
 0x38e   :  { %1811 = vmatpush1.bf16.msra.mxu1 %v4080_v19  ;;  %v4151_v19 = vld [vmem:[%s5822_s14 + $0x34] ss:$8 sps:$4 sm:$0xff]  }
 0x38f   :  { %1812 = vmatprep.subr.bf16.mxu1 %v4085_v20  ;;  %v4149_v20 = vld [vmem:[%s5822_s14 + $0x30] ss:$8 sps:$4 sm:$0xff]  }
 0x392   :  { %1813 = vmatpush1.bf16.msra.mxu1 %v4083_v21  ;;  %v4154_v21 = vld [vmem:[%s5822_s14 + $0x44] ss:$8 sps:$4 sm:$0xff]  }
 0x393   :  { %1814 = vmatprep.subr.bf16.mxu1 %v4088_v22  ;;  %v4152_v22 = vld [vmem:[%s5822_s14 + $0x40] ss:$8 sps:$4 sm:$0xff]  }
 0x396   :  { %1815 = vmatpush1.bf16.msra.mxu1 %v4086_v23  ;;  %v4157_v23 = vld [vmem:[%s5822_s14 + $0x54] ss:$8 sps:$4 sm:$0xff]  }
 0x397   :  { %1816 = vmatprep.subr.bf16.mxu1 %v4091_v24  ;;  %v4155_v24 = vld [vmem:[%s5822_s14 + $0x50] ss:$8 sps:$4 sm:$0xff]  }
 0x39a   :  { %1817 = vmatpush1.bf16.msra.mxu1 %v4089_v25  ;;  %v4160_v25 = vld [vmem:[%s5822_s14 + $0x64] ss:$8 sps:$4 sm:$0xff]  }
 0x39b   :  { %2300 = vmatprep.subr.bf16.mxu1 %v4142_v15  ;;  %v4238_v15 = vld [vmem:[%s5824_s16 + $0x1c4] ss:$28 sps:$4 sm:$0xff]  }
 0x450   :  { %v1680_v60 = vpop.f32.mrb[8].mxu1 }
 0x451   :  { %v1681_v61 = vadd.f32 %v1680_v60, %v1479_v58  ;;  %v1682_v62 = vpop.f32.mrb[9].mxu1  ;;  %v4182_v58 = vld [vmem:[%s5822_s14 + $0xe0] ss:$8 sps:$4 sm:$0xff]   ;;  %v4185_v60 = vld [vmem:[%s5822_s14 + $0xf0] ss:$8 sps:$4 sm:$0xff]  }
 0x452   :  { %v1683_v63 = vadd.f32 %v1682_v62, %v1483_v59  ;;  %v1684_v0 = vpop.f32.mrb[10].mxu1  ;;  %v4187_v59 = vld [vmem:[%s5822_s14 + $0xf4] ss:$8 sps:$4 sm:$0xff]   ;;  %v4190_v62 = vld [vmem:[%s5824_s16 + $0x4] ss:$28 sps:$4 sm:$0xff]  }
 0x453   :  { %3291 = vst [vmem:[%s5819_s19] sm:$0xff] %v1681_v61  ;;  %v1685_v1 = vpop.f32.mrb[11].mxu1  ;;  %3086 = vmatprep.subr.bf16.mxu0 %v4190_v62  ;;  %v4196_v0 = vld [vmem:[%s5824_s16 + $0x3c] ss:$28 sps:$4 sm:$0xff]  }
 0x454   :  { %v1687_v2 = vmul.f32 0.5, %v1683_v63  ;;  %3292 = vst [vmem:[%s5820_s20] sm:$0xff] %v1683_v63  ;;  %v4193_v63 = vld [vmem:[%s5824_s16 + $0xc] ss:$28 sps:$4 sm:$0xff]   ;;  %v4194_v1 = vld [vmem:[%s5824_s16 + $0x38] ss:$28 sps:$4 sm:$0xff]  }
 0x455   :  { %v4251_v62 = vld [vmem:[%s5824_s16 + $0x238] ss:$28 sps:$4 sm:$0xff]  }
 0x456   :  { %v1688_v3 = vmul.f32 1.442695, %v1687_v2  ;;  %v4202_v2 = vld [vmem:[%s5824_s16 + $0x74] ss:$28 sps:$4 sm:$0xff]  }
 0x458   :  { %4348 = vpow2.f32 %v1688_v3  ;;  %v4200_v3 = vld [vmem:[%s5824_s16 + $0x70] ss:$28 sps:$4 sm:$0xff]  }
 0x462   :  { %v4349_v5 = vpop.eup %4348 }
 0x463   :  { %v1691_v6 = vmul.f32 %v4349_v5, %v1690_v4  ;;  %v4208_v4 = vld [vmem:[%s5824_s16 + $0xac] ss:$28 sps:$4 sm:$0xff]  }
 0x464   :  { %v4206_v5 = vld [vmem:[%s5824_s16 + $0xa8] ss:$28 sps:$4 sm:$0xff]  }
 0x465   :  { %v1692_v7 = vadd.f32 %v1691_v6, %v1681_v61  ;;  %v4188_v61 = vld [vmem:[%s5824_s16] ss:$28 sps:$4 sm:$0xff]  }
 0x466   :  { %v4214_v6 = vld [vmem:[%s5824_s16 + $0xe4] ss:$28 sps:$4 sm:$0xff]  }
 0x467   :  { %v1693_v8 = vpack.c.bf16 %v1692_v7, %v1692_v7  ;;  %v4212_v7 = vld [vmem:[%s5824_s16 + $0xe0] ss:$28 sps:$4 sm:$0xff]  }
 0x469   :  { %1835 = vmatmul.mubr.bf16.vlgmr.msra.gmra.mrb[12].mxu1 %v1693_v8  ;;  %v4220_v8 = vld [vmem:[%s5824_s16 + $0x11c] ss:$28 sps:$4 sm:$0xff]  }
 0x46a   :  { %2301 = vmatpush1.bf16.msra.mxu1 %v4140_v14  ;;  %v4230_v14 = vld [vmem:[%s5824_s16 + $0x188] ss:$28 sps:$4 sm:$0xff]  }
 0x46b   :  { %2302 = vmatprep.subr.bf16.mxu1 %v4145_v16  ;;  %v4236_v16 = vld [vmem:[%s5824_s16 + $0x1c0] ss:$28 sps:$4 sm:$0xff]  }
 0x46e   :  { %2303 = vmatpush1.bf16.msra.mxu1 %v4143_v17  ;;  %v4244_v17 = vld [vmem:[%s5824_s16 + $0x1fc] ss:$28 sps:$4 sm:$0xff]  }
 0x46f   :  { %2304 = vmatprep.subr.bf16.mxu1 %v4148_v9  ;;  %v4242_v9 = vld [vmem:[%s5824_s16 + $0x1f8] ss:$28 sps:$4 sm:$0xff]  }
 0x472   :  { %2305 = vmatpush1.bf16.msra.mxu1 %v4146_v18  ;;  %v4250_v18 = vld [vmem:[%s5824_s16 + $0x234] ss:$28 sps:$4 sm:$0xff]  }
 0x473   :  { %2306 = vmatprep.subr.bf16.mxu1 %v4151_v19  ;;  %v4248_v19 = vld [vmem:[%s5824_s16 + $0x230] ss:$28 sps:$4 sm:$0xff]  }
 0x476   :  { %2307 = vmatpush1.bf16.msra.mxu1 %v4149_v20  ;;  %v4256_v20 = vld [vmem:[%s5824_s16 + $0x26c] ss:$28 sps:$4 sm:$0xff]  }
 0x477   :  { %2308 = vmatprep.subr.bf16.mxu1 %v4154_v21  ;;  %v4254_v21 = vld [vmem:[%s5824_s16 + $0x268] ss:$28 sps:$4 sm:$0xff]  }
 0x47a   :  { %2309 = vmatpush1.bf16.msra.mxu1 %v4152_v22  ;;  %v4262_v22 = vld [vmem:[%s5824_s16 + $0x2a4] ss:$28 sps:$4 sm:$0xff]  }
 0x47b   :  { %2310 = vmatprep.subr.bf16.mxu1 %v4157_v23  ;;  %v4260_v23 = vld [vmem:[%s5824_s16 + $0x2a0] ss:$28 sps:$4 sm:$0xff]  }
 0x47e   :  { %2311 = vmatpush1.bf16.msra.mxu1 %v4155_v24  ;;  %v4268_v24 = vld [vmem:[%s5824_s16 + $0x2dc] ss:$28 sps:$4 sm:$0xff]  }
 0x47f   :  { %2312 = vmatprep.subr.bf16.mxu1 %v4160_v25  ;;  %v4266_v25 = vld [vmem:[%s5824_s16 + $0x2d8] ss:$28 sps:$4 sm:$0xff]  }
 0x482   :  { %2313 = vmatpush1.bf16.msra.mxu1 %v4158_v26  ;;  %v1879_v26 = vld [vmem:[%s5825_s13] sm:$0x3] }
 0x483   :  { %2314 = vmatprep.subr.bf16.mxu1 %v4163_v27  ;;  %v1884_v27 = vrot.slane %v1879_v26, %v4947_v30 }
 0x486   :  { %2315 = vmatpush1.bf16.msra.mxu1 %v4161_v28  ;;  %v1888_v28 = vrot.slane %v1879_v26, %v4953_v32 }
 0x487   :  { %2316 = vmatprep.subr.bf16.mxu1 %v4166_v31 }
 0x48a   :  { %2317 = vmatpush1.bf16.msra.mxu1 %v4164_v33 }
 0x48b   :  { %2318 = vmatprep.subr.bf16.mxu1 %v4169_v34 }
 0x48e   :  { %2319 = vmatpush1.bf16.msra.mxu1 %v4167_v35 }
 0x48f   :  { %2320 = vmatprep.subr.bf16.mxu1 %v4172_v36 }
 0x492   :  { %2321 = vmatpush1.bf16.msra.mxu1 %v4170_v37 }
 0x493   :  { %2322 = vmatprep.subr.bf16.mxu1 %v4175_v38 }
 0x496   :  { %2323 = vmatpush1.bf16.msra.mxu1 %v4173_v39 }
 0x497   :  { %2324 = vmatprep.subr.bf16.mxu1 %v4178_v40 }
 0x49a   :  { %2325 = vmatpush1.bf16.msra.mxu1 %v4176_v41  ;;  %v4191_v41 = vld [vmem:[%s5824_s16 + $0x8] ss:$28 sps:$4 sm:$0xff]  }
 0x49b   :  { %2326 = vmatprep.subr.bf16.mxu1 %v4181_v42 }
 0x49e   :  { %2327 = vmatpush1.bf16.msra.mxu1 %v4179_v43  ;;  %v4199_v43 = vld [vmem:[%s5824_s16 + $0x44] ss:$28 sps:$4 sm:$0xff]  }
 0x49f   :  { %2328 = vmatprep.subr.bf16.mxu1 %v4184_v57  ;;  %v4241_v57 = vld [vmem:[%s5824_s16 + $0x1cc] ss:$28 sps:$4 sm:$0xff]  }
 0x4a2   :  { %2329 = vmatpush1.bf16.msra.mxu1 %v4182_v58  ;;  %v4239_v58 = vld [vmem:[%s5824_s16 + $0x1c8] ss:$28 sps:$4 sm:$0xff]  }
 0x4a3   :  { %2330 = vmatprep.subr.bf16.mxu1 %v4187_v59  ;;  %v4247_v59 = vld [vmem:[%s5824_s16 + $0x204] ss:$28 sps:$4 sm:$0xff]  }
 0x4a6   :  { %2331 = vmatpush1.bf16.msra.mxu1 %v4185_v60  ;;  %v4245_v60 = vld [vmem:[%s5824_s16 + $0x200] ss:$28 sps:$4 sm:$0xff]  }
 0x4a7   :  { %3127 = vmatprep.subr.bf16.mxu1 %v4193_v63  ;;  %v4259_v63 = vld [vmem:[%s5824_s16 + $0x274] ss:$28 sps:$4 sm:$0xff]  }
 0x53c   :  { %v1836_v47 = vpop.f32.mrb[12].mxu1 }
 0x53d   :  { %v1837_v48 = vadd.f32 %v1836_v47, %v1715_v45  ;;  %v1838_v49 = vpop.f32.mrb[13].mxu1  ;;  %v4205_v45 = vld [vmem:[%s5824_s16 + $0x7c] ss:$28 sps:$4 sm:$0xff]   ;;  %v4211_v47 = vld [vmem:[%s5824_s16 + $0xb4] ss:$28 sps:$4 sm:$0xff]  }
 0x53e   :  { %v1839_v50 = vadd.f32 %v1838_v49, %v1719_v46  ;;  %v1840_v51 = vpop.f32.mrb[14].mxu1  ;;  %v4203_v46 = vld [vmem:[%s5824_s16 + $0x78] ss:$28 sps:$4 sm:$0xff]   ;;  %v4217_v49 = vld [vmem:[%s5824_s16 + $0xec] ss:$28 sps:$4 sm:$0xff]  }
 0x53f   :  { %v1843_v52 = vmax.f32 %v1837_v48, 0.0  ;;  %v1841_v53 = vpop.f32.mrb[15].mxu1  ;;  %v4209_v48 = vld [vmem:[%s5824_s16 + $0xb0] ss:$28 sps:$4 sm:$0xff]   ;;  %v4223_v51 = vld [vmem:[%s5824_s16 + $0x124] ss:$28 sps:$4 sm:$0xff]  }
 0x540   :  { %v1844_v54 = vmax.f32 %v1839_v50, 0.0  ;;  %v4215_v50 = vld [vmem:[%s5824_s16 + $0xe8] ss:$28 sps:$4 sm:$0xff]   ;;  %v4229_v53 = vld [vmem:[%s5824_s16 + $0x15c] ss:$28 sps:$4 sm:$0xff]  }
 0x541   :  { %v1845_v56 = vpack.c.bf16 %v1843_v52, %v1843_v52  ;;  %v4221_v52 = vld [vmem:[%s5824_s16 + $0x120] ss:$28 sps:$4 sm:$0xff]  }
 0x542   :  { %v1846_v55 = vpack.c.bf16 %v1844_v54, %v1844_v54  ;;  %v4227_v54 = vld [vmem:[%s5824_s16 + $0x158] ss:$28 sps:$4 sm:$0xff]  }
 0x544   :  { %2083 = vmatprep.mubr.bf16.mxu0 %v1846_v55  ;;  %v4235_v55 = vld [vmem:[%s5824_s16 + $0x194] ss:$28 sps:$4 sm:$0xff]  }
 0x545   :  { %2084 = vmatmul.mubr.bf16.vlgmr.msra.gmra.mrb[4].mxu0 %v1845_v56  ;;  %v4233_v56 = vld [vmem:[%s5824_s16 + $0x190] ss:$28 sps:$4 sm:$0xff]  }
 0x546   :  { %3087 = vmatpush1.bf16.msra.mxu0 %v4188_v61  ;;  %v4253_v61 = vld [vmem:[%s5824_s16 + $0x23c] ss:$28 sps:$4 sm:$0xff]  }
 0x547   :  { %3088 = vmatprep.subr.bf16.mxu0 %v4196_v0  ;;  %v4257_v0 = vld [vmem:[%s5824_s16 + $0x270] ss:$28 sps:$4 sm:$0xff]  }
 0x54a   :  { %3089 = vmatpush1.bf16.msra.mxu0 %v4194_v1  ;;  %v4265_v1 = vld [vmem:[%s5824_s16 + $0x2ac] ss:$28 sps:$4 sm:$0xff]  }
 0x54b   :  { %3090 = vmatprep.subr.bf16.mxu0 %v4202_v2  ;;  %v4263_v2 = vld [vmem:[%s5824_s16 + $0x2a8] ss:$28 sps:$4 sm:$0xff]  }
 0x54e   :  { %3091 = vmatpush1.bf16.msra.mxu0 %v4200_v3  ;;  %v4271_v3 = vld [vmem:[%s5824_s16 + $0x2e4] ss:$28 sps:$4 sm:$0xff]  }
 0x54f   :  { %3092 = vmatprep.subr.bf16.mxu0 %v4208_v4  ;;  %v4269_v4 = vld [vmem:[%s5824_s16 + $0x2e0] ss:$28 sps:$4 sm:$0xff]  }
 0x552   :  { %3093 = vmatpush1.bf16.msra.mxu0 %v4206_v5  ;;  %v4274_v5 = vld [vmem:[%s5824_s16 + $0x314] ss:$28 sps:$4 sm:$0xff]  }
 0x553   :  { %3094 = vmatprep.subr.bf16.mxu0 %v4214_v6  ;;  %v4277_v6 = vld [vmem:[%s5824_s16 + $0x31c] ss:$28 sps:$4 sm:$0xff]  }
 0x556   :  { %3095 = vmatpush1.bf16.msra.mxu0 %v4212_v7  ;;  %v4272_v7 = vld [vmem:[%s5824_s16 + $0x310] ss:$28 sps:$4 sm:$0xff]  }
 0x557   :  { %3096 = vmatprep.subr.bf16.mxu0 %v4220_v8  ;;  %v4275_v8 = vld [vmem:[%s5824_s16 + $0x318] ss:$28 sps:$4 sm:$0xff]  }
 0x55a   :  { %3097 = vmatpush1.bf16.msra.mxu0 %v4218_v10  ;;  %v4280_v10 = vld [vmem:[%s5824_s16 + $0x34c] ss:$28 sps:$4 sm:$0xff]  }
 0x55b   :  { %3098 = vmatprep.subr.bf16.mxu0 %v4226_v11  ;;  %v4283_v11 = vld [vmem:[%s5824_s16 + $0x354] ss:$28 sps:$4 sm:$0xff]  }
 0x55e   :  { %3099 = vmatpush1.bf16.msra.mxu0 %v4224_v12  ;;  %v4278_v12 = vld [vmem:[%s5824_s16 + $0x348] ss:$28 sps:$4 sm:$0xff]  }
 0x55f   :  { %3100 = vmatprep.subr.bf16.mxu0 %v4232_v13  ;;  %v4281_v13 = vld [vmem:[%s5824_s16 + $0x350] ss:$28 sps:$4 sm:$0xff]  }
 0x562   :  { %3101 = vmatpush1.bf16.msra.mxu0 %v4230_v14  ;;  %v4286_v14 = vld [vmem:[%s5824_s16 + $0x14] ss:$28 sps:$4 sm:$0xff]  }
 0x563   :  { %3102 = vmatprep.subr.bf16.mxu0 %v4238_v15  ;;  %v4287_v15 = vld [vmem:[%s5824_s16 + $0x1d8] ss:$28 sps:$4 sm:$0xff]  }
 0x566   :  { %3103 = vmatpush1.bf16.msra.mxu0 %v4236_v16  ;;  %v2128_v16 = vld [vmem:[%s5826_s15] sm:$0x3] }
 0x567   :  { %3104 = vmatprep.subr.bf16.mxu0 %v4244_v17  ;;  %v2133_v17 = vrot.slane %v2128_v16, %v4947_v30 }
 0x56a   :  { %3105 = vmatpush1.bf16.msra.mxu0 %v4242_v9  ;;  %v2137_v9 = vrot.slane %v2128_v16, %v4953_v32  ;;  %v2489_v16 = vsub.s32 3, %v4944_v29 }
 0x56b   :  { %3106 = vmatprep.subr.bf16.mxu0 %v4250_v18 }
 0x56e   :  { %3107 = vmatpush1.bf16.msra.mxu0 %v4248_v19 }
 0x56f   :  { %3108 = vmatprep.subr.bf16.mxu0 %v4256_v20 }
 0x572   :  { %3109 = vmatpush1.bf16.msra.mxu0 %v4254_v21 }
 0x573   :  { %3110 = vmatprep.subr.bf16.mxu0 %v4262_v22 }
 0x576   :  { %3111 = vmatpush1.bf16.msra.mxu0 %v4260_v23 }
 0x577   :  { %3112 = vmatprep.subr.bf16.mxu0 %v4268_v24 }
 0x57a   :  { %3113 = vmatpush1.bf16.msra.mxu0 %v4266_v25 }
 0x57b   :  { %3114 = vmatprep.subr.bf16.mxu0 %v4274_v5  ;;  %v4338_v5 = vld [vmem:[%s5824_s16 + $0x2b4] ss:$28 sps:$4 sm:$0xff]  }
 0x57e   :  { %3115 = vmatpush1.bf16.msra.mxu0 %v4272_v7  ;;  %v4341_v7 = vld [vmem:[%s5824_s16 + $0x2ec] ss:$28 sps:$4 sm:$0xff]  }
 0x57f   :  { %3116 = vmatprep.subr.bf16.mxu0 %v4280_v10  ;;  %v4344_v10 = vld [vmem:[%s5824_s16 + $0x324] ss:$28 sps:$4 sm:$0xff]  }
 0x582   :  { %3117 = vmatpush1.bf16.msra.mxu0 %v4278_v12  ;;  %v4347_v12 = vld [vmem:[%s5824_s16 + $0x35c] ss:$28 sps:$4 sm:$0xff]  }
 0x583   :  { %3168 = vmatprep.subr.bf16.mxu0 %v4286_v14  ;;  %v2485_v14 = vsub.s32 2, %v4944_v29 }
 0x618   :  { %v2085_v31 = vpop.f32.mrb[4].mxu0 }
 0x619   :  { %v2086_v33 = vadd.f32 %v2085_v31, %v1884_v27  ;;  %v2087_v34 = vpop.f32.mrb[5].mxu0  ;;  %v4284_v27 = vld [vmem:[%s5824_s16 + $0x10] ss:$28 sps:$4 sm:$0xff]  }
 0x61a   :  { %v2088_v35 = vadd.f32 %v2087_v34, %v1888_v28  ;;  %v2089_v36 = vpop.f32.mrb[6].mxu0  ;;  %v4288_v28 = vld [vmem:[%s5824_s16 + $0x18] ss:$28 sps:$4 sm:$0xff]   ;;  %v4292_v34 = vld [vmem:[%s5824_s16 + $0x210] ss:$28 sps:$4 sm:$0xff]  }
 0x61b   :  { %v2092_v37 = vmax.f32 %v2086_v33, 0.0  ;;  %v2090_v38 = vpop.f32.mrb[7].mxu0  ;;  %v4291_v33 = vld [vmem:[%s5824_s16 + $0x4c] ss:$28 sps:$4 sm:$0xff]  }
 0x61c   :  { %v2093_v39 = vmax.f32 %v2088_v35, 0.0  ;;  %v4289_v35 = vld [vmem:[%s5824_s16 + $0x48] ss:$28 sps:$4 sm:$0xff]   ;;  %v4293_v36 = vld [vmem:[%s5824_s16 + $0x50] ss:$28 sps:$4 sm:$0xff]  }
 0x61d   :  { %v2094_v42 = vpack.c.bf16 %v2092_v37, %v2092_v37  ;;  %v4296_v37 = vld [vmem:[%s5824_s16 + $0x84] ss:$28 sps:$4 sm:$0xff]  }
 0x61e   :  { %v2095_v40 = vpack.c.bf16 %v2093_v39, %v2093_v39  ;;  %v4297_v38 = vld [vmem:[%s5824_s16 + $0x248] ss:$28 sps:$4 sm:$0xff]   ;;  %v4294_v39 = vld [vmem:[%s5824_s16 + $0x80] ss:$28 sps:$4 sm:$0xff]  }
 0x620   :  { %2332 = vmatprep.mubr.bf16.mxu1 %v2095_v40  ;;  %v4298_v40 = vld [vmem:[%s5824_s16 + $0x88] ss:$28 sps:$4 sm:$0xff]  }
 0x621   :  { %2333 = vmatmul.mubr.bf16.vlgmr.msra.gmra.mrb[16].mxu1 %v2094_v42  ;;  %v4302_v42 = vld [vmem:[%s5824_s16 + $0x280] ss:$28 sps:$4 sm:$0xff]  }
 0x622   :  { %3128 = vmatpush1.bf16.msra.mxu1 %v4191_v41  ;;  %v4301_v41 = vld [vmem:[%s5824_s16 + $0xbc] ss:$28 sps:$4 sm:$0xff]  }
 0x623   :  { %3129 = vmatprep.subr.bf16.mxu1 %v4199_v43  ;;  %v4299_v43 = vld [vmem:[%s5824_s16 + $0xb8] ss:$28 sps:$4 sm:$0xff]  }
 0x626   :  { %3130 = vmatpush1.bf16.msra.mxu1 %v4197_v44  ;;  %v4303_v44 = vld [vmem:[%s5824_s16 + $0xc0] ss:$28 sps:$4 sm:$0xff]  }
 0x627   :  { %3131 = vmatprep.subr.bf16.mxu1 %v4205_v45  ;;  %v4306_v45 = vld [vmem:[%s5824_s16 + $0xf4] ss:$28 sps:$4 sm:$0xff]  }
 0x62a   :  { %3132 = vmatpush1.bf16.msra.mxu1 %v4203_v46  ;;  %v4307_v46 = vld [vmem:[%s5824_s16 + $0x2b8] ss:$28 sps:$4 sm:$0xff]  }
 0x62b   :  { %3133 = vmatprep.subr.bf16.mxu1 %v4211_v47  ;;  %v4304_v47 = vld [vmem:[%s5824_s16 + $0xf0] ss:$28 sps:$4 sm:$0xff]  }
 0x62e   :  { %3134 = vmatpush1.bf16.msra.mxu1 %v4209_v48  ;;  %v4308_v48 = vld [vmem:[%s5824_s16 + $0xf8] ss:$28 sps:$4 sm:$0xff]  }
 0x62f   :  { %3135 = vmatprep.subr.bf16.mxu1 %v4217_v49  ;;  %v4311_v49 = vld [vmem:[%s5824_s16 + $0x12c] ss:$28 sps:$4 sm:$0xff]  }
 0x632   :  { %3136 = vmatpush1.bf16.msra.mxu1 %v4215_v50  ;;  %v4312_v50 = vld [vmem:[%s5824_s16 + $0x2f0] ss:$28 sps:$4 sm:$0xff]  }
 0x633   :  { %3137 = vmatprep.subr.bf16.mxu1 %v4223_v51  ;;  %v4309_v51 = vld [vmem:[%s5824_s16 + $0x128] ss:$28 sps:$4 sm:$0xff]  }
 0x636   :  { %3138 = vmatpush1.bf16.msra.mxu1 %v4221_v52  ;;  %v4313_v52 = vld [vmem:[%s5824_s16 + $0x130] ss:$28 sps:$4 sm:$0xff]  }
 0x637   :  { %3139 = vmatprep.subr.bf16.mxu1 %v4229_v53  ;;  %v4316_v53 = vld [vmem:[%s5824_s16 + $0x164] ss:$28 sps:$4 sm:$0xff]  }
 0x63a   :  { %3140 = vmatpush1.bf16.msra.mxu1 %v4227_v54  ;;  %v4317_v54 = vld [vmem:[%s5824_s16 + $0x328] ss:$28 sps:$4 sm:$0xff]  }
 0x63b   :  { %3141 = vmatprep.subr.bf16.mxu1 %v4235_v55  ;;  %v4314_v55 = vld [vmem:[%s5824_s16 + $0x160] ss:$28 sps:$4 sm:$0xff]  }
 0x63e   :  { %3142 = vmatpush1.bf16.msra.mxu1 %v4233_v56  ;;  %v4318_v56 = vld [vmem:[%s5824_s16 + $0x168] ss:$28 sps:$4 sm:$0xff]  }
 0x63f   :  { %3143 = vmatprep.subr.bf16.mxu1 %v4241_v57  ;;  %v4321_v57 = vld [vmem:[%s5824_s16 + $0x19c] ss:$28 sps:$4 sm:$0xff]  }
 0x642   :  { %3144 = vmatpush1.bf16.msra.mxu1 %v4239_v58  ;;  %v4322_v58 = vld [vmem:[%s5824_s16 + $0x360] ss:$28 sps:$4 sm:$0xff]  }
 0x643   :  { %3145 = vmatprep.subr.bf16.mxu1 %v4247_v59  ;;  %v4319_v59 = vld [vmem:[%s5824_s16 + $0x198] ss:$28 sps:$4 sm:$0xff]  }
 0x646   :  { %3146 = vmatpush1.bf16.msra.mxu1 %v4245_v60  ;;  %v4323_v60 = vld [vmem:[%s5824_s16 + $0x1a0] ss:$28 sps:$4 sm:$0xff]  }
 0x647   :  { %3147 = vmatprep.subr.bf16.mxu1 %v4253_v61  ;;  %v4326_v61 = vld [vmem:[%s5824_s16 + $0x1d4] ss:$28 sps:$4 sm:$0xff]  }
 0x64a   :  { %3148 = vmatpush1.bf16.msra.mxu1 %v4251_v62  ;;  %v4324_v62 = vld [vmem:[%s5824_s16 + $0x1d0] ss:$28 sps:$4 sm:$0xff]  }
 0x64b   :  { %3149 = vmatprep.subr.bf16.mxu1 %v4259_v63  ;;  %v4329_v63 = vld [vmem:[%s5824_s16 + $0x20c] ss:$28 sps:$4 sm:$0xff]  }
 0x64e   :  { %3150 = vmatpush1.bf16.msra.mxu1 %v4257_v0  ;;  %v4327_v0 = vld [vmem:[%s5824_s16 + $0x208] ss:$28 sps:$4 sm:$0xff]  }
 0x64f   :  { %3151 = vmatprep.subr.bf16.mxu1 %v4265_v1  ;;  %v4332_v1 = vld [vmem:[%s5824_s16 + $0x244] ss:$28 sps:$4 sm:$0xff]  }
 0x652   :  { %3152 = vmatpush1.bf16.msra.mxu1 %v4263_v2  ;;  %v4330_v2 = vld [vmem:[%s5824_s16 + $0x240] ss:$28 sps:$4 sm:$0xff]  }
 0x653   :  { %3153 = vmatprep.subr.bf16.mxu1 %v4271_v3  ;;  %v4335_v3 = vld [vmem:[%s5824_s16 + $0x27c] ss:$28 sps:$4 sm:$0xff]  }
 0x656   :  { %3154 = vmatpush1.bf16.msra.mxu1 %v4269_v4  ;;  %v4333_v4 = vld [vmem:[%s5824_s16 + $0x278] ss:$28 sps:$4 sm:$0xff]  }
 0x657   :  { %3155 = vmatprep.subr.bf16.mxu1 %v4277_v6  ;;  %v4336_v6 = vld [vmem:[%s5824_s16 + $0x2b0] ss:$28 sps:$4 sm:$0xff]  }
 0x65a   :  { %3156 = vmatpush1.bf16.msra.mxu1 %v4275_v8  ;;  %v4339_v8 = vld [vmem:[%s5824_s16 + $0x2e8] ss:$28 sps:$4 sm:$0xff]  }
 0x65b   :  { %3157 = vmatprep.subr.bf16.mxu1 %v4283_v11  ;;  %v4342_v11 = vld [vmem:[%s5824_s16 + $0x320] ss:$28 sps:$4 sm:$0xff]  }
 0x65e   :  { %3158 = vmatpush1.bf16.msra.mxu1 %v4281_v13  ;;  %v4345_v13 = vld [vmem:[%s5824_s16 + $0x358] ss:$28 sps:$4 sm:$0xff]  }
 0x65f   :  { %3712 = vmatprep.subr.bf16.mxu1 %v4287_v15  ;;  %v5772_v15 = vld [vmem:[%s5827_s17] sm:$0xff] }
 0x6f4   :  { %v2334_v18 = vpop.f32.mrb[16].mxu1 }
 0x6f5   :  { %v2335_v19 = vadd.f32 %v2334_v18, %v2133_v17  ;;  %v2336_v20 = vpop.f32.mrb[17].mxu1  ;;  %v2478_v17 = vrot.slane %v5772_v15, %v4947_v30  ;;  %v2482_v18 = vrot.slane %v5772_v15, %v4953_v32 }
 0x6f6   :  { %v2337_v21 = vadd.f32 %v2336_v20, %v2137_v9  ;;  %v2338_v22 = vpop.f32.mrb[18].mxu1  ;;  %v2486_v9 = vrot.slane %v5772_v15, %v2485_v14 }
 0x6f7   :  { %v2341_v23 = vmax.f32 %v2335_v19, 0.0  ;;  %v2339_v24 = vpop.f32.mrb[19].mxu1  ;;  %v2490_v19 = vrot.slane %v5772_v15, %v2489_v16 }
 0x6f8   :  { %v2342_v25 = vmax.f32 %v2337_v21, 0.0 }
 0x6f9   :  { %v5630_v31 = vpack.c.bf16 %v2341_v23, %v2341_v23 }
 0x6fa   :  { %v2344_v26 = vpack.c.bf16 %v2342_v25, %v2342_v25 }
 0x6fc   :  { %3118 = vmatprep.mubr.bf16.mxu0 %v2344_v26  ;;  %3159 = vmatprep.mubr.bf16.mxu1 %v2344_v26 }
 0x6fd   :  { %3119 = vmatmul.mubr.bf16.vlgmr.msra.gmra.mrb[8].mxu0 %v5630_v31  ;;  %3160 = vmatmul.mubr.bf16.vlgmr.msra.gmra.mrb[20].mxu1 %v5630_v31 }
 0x6fe   :  { %3169 = vmatpush1.bf16.msra.mxu0 %v4284_v27  ;;  %3713 = vmatpush3.bf16.msra.mxu1 %v4288_v28 }
 0x6ff   :  { %3200 = vmatprep.mubr.bf16.mxu0 %v2344_v26  ;;  %3241 = vmatprep.mubr.bf16.mxu1 %v2344_v26 }
 0x700   :  { %3170 = vmatprep.subr.bf16.mxu0 %v4291_v33  ;;  %3714 = vmatprep.subr.bf16.mxu1 %v4292_v34 }
 0x702   :  { %3171 = vmatpush1.bf16.msra.mxu0 %v4289_v35  ;;  %3715 = vmatpush3.bf16.msra.mxu1 %v4293_v36 }
 0x703   :  { %3172 = vmatprep.subr.bf16.mxu0 %v4296_v37  ;;  %3716 = vmatprep.subr.bf16.mxu1 %v4297_v38 }
 0x706   :  { %3173 = vmatpush1.bf16.msra.mxu0 %v4294_v39  ;;  %3717 = vmatpush3.bf16.msra.mxu1 %v4298_v40 }
 0x707   :  { %3174 = vmatprep.subr.bf16.mxu0 %v4301_v41  ;;  %3718 = vmatprep.subr.bf16.mxu1 %v4302_v42 }
 0x70a   :  { %3175 = vmatpush1.bf16.msra.mxu0 %v4299_v43  ;;  %3719 = vmatpush3.bf16.msra.mxu1 %v4303_v44 }
 0x70b   :  { %3176 = vmatprep.subr.bf16.mxu0 %v4306_v45  ;;  %3720 = vmatprep.subr.bf16.mxu1 %v4307_v46 }
 0x70e   :  { %3177 = vmatpush1.bf16.msra.mxu0 %v4304_v47  ;;  %3721 = vmatpush3.bf16.msra.mxu1 %v4308_v48 }
 0x70f   :  { %3178 = vmatprep.subr.bf16.mxu0 %v4311_v49  ;;  %3722 = vmatprep.subr.bf16.mxu1 %v4312_v50  ;;  %v2501_v49 = vsub.s32 6, %v4944_v29 }
 0x712   :  { %3179 = vmatpush1.bf16.msra.mxu0 %v4309_v51  ;;  %3723 = vmatpush3.bf16.msra.mxu1 %v4313_v52 }
 0x713   :  { %3180 = vmatprep.subr.bf16.mxu0 %v4316_v53  ;;  %3724 = vmatprep.subr.bf16.mxu1 %v4317_v54  ;;  %v2502_v54 = vrot.slane %v5772_v15, %v2501_v49 }
 0x716   :  { %3181 = vmatpush1.bf16.msra.mxu0 %v4314_v55  ;;  %3725 = vmatpush3.bf16.msra.mxu1 %v4318_v56 }
 0x717   :  { %3182 = vmatprep.subr.bf16.mxu0 %v4321_v57  ;;  %3726 = vmatprep.subr.bf16.mxu1 %v4322_v58 }
 0x71a   :  { %3183 = vmatpush1.bf16.msra.mxu0 %v4319_v59  ;;  %3727 = vmatpush3.bf16.msra.mxu1 %v4323_v60 }
 0x71b   :  { %3184 = vmatprep.subr.bf16.mxu0 %v4326_v61 }
 0x71d   :  { %3242 = vmatmul.mubr.bf16.vlgmr.msra.gmra.mrb[24].mxu1 %v5630_v31 }
 0x71e   :  { %3185 = vmatpush1.bf16.msra.mxu0 %v4324_v62 }
 0x71f   :  { %3186 = vmatprep.subr.bf16.mxu0 %v4329_v63 }
 0x722   :  { %3187 = vmatpush1.bf16.msra.mxu0 %v4327_v0 }
 0x723   :  { %3188 = vmatprep.subr.bf16.mxu0 %v4332_v1  ;;  %v2493_v1 = vsub.s32 4, %v4944_v29 }
 0x726   :  { %3189 = vmatpush1.bf16.msra.mxu0 %v4330_v2  ;;  %v2497_v2 = vsub.s32 5, %v4944_v29 }
 0x727   :  { %3190 = vmatprep.subr.bf16.mxu0 %v4335_v3  ;;  %v2494_v3 = vrot.slane %v5772_v15, %v2493_v1 }
 0x72a   :  { %3191 = vmatpush1.bf16.msra.mxu0 %v4333_v4  ;;  %v2498_v4 = vrot.slane %v5772_v15, %v2497_v2 }
 0x72b   :  { %3192 = vmatprep.subr.bf16.mxu0 %v4338_v5 }
 0x72e   :  { %3193 = vmatpush1.bf16.msra.mxu0 %v4336_v6 }
 0x72f   :  { %3194 = vmatprep.subr.bf16.mxu0 %v4341_v7 }
 0x732   :  { %3195 = vmatpush1.bf16.msra.mxu0 %v4339_v8 }
 0x733   :  { %3196 = vmatprep.subr.bf16.mxu0 %v4344_v10 }
 0x736   :  { %3197 = vmatpush1.bf16.msra.mxu0 %v4342_v11 }
 0x737   :  { %3198 = vmatprep.subr.bf16.mxu0 %v4347_v12 }
 0x73a   :  { %3199 = vmatpush1.bf16.msra.mxu0 %v4345_v13 }
 0x73d   :  { %3201 = vmatmul.mubr.bf16.vlgmr.msra.gmra.mrb[12].mxu0 %v5630_v31 }
 0x7d0   :  { %v3120_v20 = vpop.f32.mrb[8].mxu0  ;;  %v3161_v21 = vpop.f32.mrb[20].mxu1 }
 0x7d1   :  { %v3121_v22 = vadd.f32 %v3120_v20, %v2478_v17  ;;  %v3162_v23 = vadd.f32 %v3161_v21, %v2486_v9  ;;  %v3122_v24 = vpop.f32.mrb[9].mxu0  ;;  %v3163_v25 = vpop.f32.mrb[21].mxu1 }
 0x7d2   :  { %v3123_v26 = vadd.f32 %v3122_v24, %v2482_v18  ;;  %v3164_v27 = vadd.f32 %v3163_v25, %v2490_v19  ;;  %v3124_v28 = vpop.f32.mrb[10].mxu0  ;;  %v3165_v31 = vpop.f32.mrb[22].mxu1 }
 0x7d3   :  { %v3249_v33 = vsub.f32 0.0, %v3121_v22  ;;  %v3251_v34 = vsub.f32 0.0, %v3162_v23  ;;  %v3125_v30 = vpop.f32.mrb[11].mxu0  ;;  %v3166_v35 = vpop.f32.mrb[23].mxu1 }
 0x7d4   :  { %v3250_v36 = vsub.f32 0.0, %v3123_v26  ;;  %v3252_v37 = vsub.f32 0.0, %v3164_v27 }
 0x7d5   :  { %v3256_v38 = vmul.f32 1.442695, %v3249_v33  ;;  %v3260_v32 = vmul.f32 1.442695, %v3251_v34 }
 0x7d6   :  { %v3258_v39 = vmul.f32 1.442695, %v3250_v36  ;;  %v3262_v40 = vmul.f32 1.442695, %v3252_v37 }
 0x7d7   :  { %4350 = vpow2.f32 %v3256_v38 }
 0x7d8   :  { %4352 = vpow2.f32 %v3260_v32 }
 0x7d9   :  { %4354 = vpow2.f32 %v3258_v39 }
 0x7da   :  { %4356 = vpow2.f32 %v3262_v40 }
 0x7e1   :  { %v4351_v41 = vpop.eup %4350 }
 0x7e2   :  { %v4353_v42 = vpop.eup %4352  ;;  %v3270_v43 = vadd.f32 1.0, %v4351_v41 }
 0x7e3   :  { %v4355_v44 = vpop.eup %4354  ;;  %v3272_v45 = vadd.f32 1.0, %v4353_v42 }
 0x7e4   :  { %v4357_v46 = vpop.eup %4356  ;;  %4358 = vrcp.f32 %v3270_v43  ;;  %v3271_v47 = vadd.f32 1.0, %v4355_v44 }
 0x7e5   :  { %4360 = vrcp.f32 %v3272_v45  ;;  %v3273_v48 = vadd.f32 1.0, %v4357_v46 }
 0x7e6   :  { %4362 = vrcp.f32 %v3271_v47 }
 0x7e7   :  { %4364 = vrcp.f32 %v3273_v48 }
 0x7ee   :  { %v4359_v50 = vpop.eup %4358 }
 0x7ef   :  { %v4361_v51 = vpop.eup %4360  ;;  %3284 = vst [vmem:[%s5828_s18] sm:$0xff] %v4359_v50 }
 0x7f0   :  { %v4363_v52 = vpop.eup %4362  ;;  %3286 = vst [vmem:[%s5828_s18 + $0x10] sm:$0xff] %v4361_v51  ;;  %v3728_v53 = vpop.f32.mrb[24].mxu1 }
 0x7f1   :  { %v4365_v55 = vpop.eup %4364  ;;  %3285 = vst [vmem:[%s5828_s18 + $0x8] sm:$0xff] %v4363_v52  ;;  %v3729_v56 = vpop.f32.mrb[25].mxu1 }
 0x7f2   :  { %3287 = vst [vmem:[%s5828_s18 + $0x18] sm:$0xff] %v4365_v55  ;;  %v3730_v57 = vadd.f32 %v3729_v56, %v3728_v53  ;;  %v3731_v58 = vpop.f32.mrb[26].mxu1 }
 0x7f3   :  { %v3732_v59 = vpop.f32.mrb[27].mxu1 }
 0x7f4   :  { %v3244_v60 = vadd.f32 %v3730_v57, %v2502_v54 }
 0x7f6   :  { %v3255_v61 = vsub.f32 0.0, %v3244_v60 }
 0x7f8   :  { %v3268_v62 = vmul.f32 1.442695, %v3255_v61 }
 0x7fa   :  { %4366 = vpow2.f32 %v3268_v62 }
 0x804   :  { %v4367_v63 = vpop.eup %4366 }
 0x805   :  { %v3276_v0 = vadd.f32 1.0, %v4367_v63 }
 0x807   :  { %4368 = vrcp.f32 %v3276_v0 }
 0x810   :  { %v3202_v5 = vpop.f32.mrb[12].mxu0 }
 0x811   :  { %v4369_v6 = vpop.eup %4368  ;;  %v3203_v7 = vadd.f32 %v3202_v5, %v2494_v3  ;;  %v3204_v8 = vpop.f32.mrb[13].mxu0 }
 0x812   :  { %3290 = vst [vmem:[%s5828_s18 + $0x30] sm:$0xff] %v4369_v6  ;;  %v3205_v10 = vadd.f32 %v3204_v8, %v2498_v4  ;;  %v3206_v11 = vpop.f32.mrb[14].mxu0 }
 0x813   :  { %v3253_v12 = vsub.f32 0.0, %v3203_v7  ;;  %v3207_v13 = vpop.f32.mrb[15].mxu0 }
 0x814   :  { %v3254_v14 = vsub.f32 0.0, %v3205_v10 }
 0x815   :  { %v3264_v16 = vmul.f32 1.442695, %v3253_v12 }
 0x816   :  { %v3266_v17 = vmul.f32 1.442695, %v3254_v14 }
 0x817   :  { %4370 = vpow2.f32 %v3264_v16 }
 0x818   :  { %4372 = vpow2.f32 %v3266_v17 }
 0x821   :  { %v4371_v29 = vpop.eup %4370 }
 0x822   :  { %v4373_v9 = vpop.eup %4372  ;;  %v3274_v15 = vadd.f32 1.0, %v4371_v29 }
 0x823   :  { %v3275_v18 = vadd.f32 1.0, %v4373_v9 }
 0x824   :  { %4374 = vrcp.f32 %v3274_v15 }
 0x825   :  { %4376 = vrcp.f32 %v3275_v18 }
 0x82e   :  { %v4375_v19 = vpop.eup %4374 }
 0x82f   :  { %v4377_v20 = vpop.eup %4376  ;;  %3288 = vst [vmem:[%s5828_s18 + $0x20] sm:$0xff] %v4375_v19 }
 0x830   :  { %3289 = vst [vmem:[%s5828_s18 + $0x28] sm:$0xff] %v4377_v20 }

</bundles_post_ra>
